<compile_context>
chip_gen: v7x
topology: tpu7x:2x2x1
jax: 0.10.0
libtpu: 0.0.40
codegen_flags: <defaults>
</compile_context>

<pallas_src>
import functools

import jax
import jax.numpy as jnp
from jax.experimental import pallas as pl
from jax.experimental.pallas import tpu as pltpu

# True hidden sizes (PyTorch) and their lane-padded kernel sizes.
H1, H2 = 400, 300
H1P, H2P = 512, 384          # multiples of 128
OUT_PAD = 128                # lane-dense output block; lane 0 = q1, lane 1 = q2
MAX_TILE_M = 256             # matches 256x256 MXU on v6e/v7x; fine (2x128) on v5e


def _round_up(x, m):
    return (x + m - 1) // m * m


def _chip_info():
    """(num_tensorcores, use_bf16_epilogue). Conservative fallback: (1, True)."""
    kind = ""
    try:
        kind = (jax.devices()[0].device_kind or "").lower()
    except Exception:
        pass
    num_cores = 2 if "v7" in kind else 1       # v7x: 2 TensorCores per chip
    use_bf16_epilogue = "v5" not in kind       # v5e VPU has no bf16 path
    return num_cores, use_bf16_epilogue


def _bias_relu(acc_f32, bias_f32, bf16_epilogue):
    """Bias-add + ReLU, returning bf16 for the next MXU stage."""
    if bf16_epilogue:
        h = acc_f32.astype(jnp.bfloat16) + bias_f32.astype(jnp.bfloat16)
        return jnp.maximum(h, 0)
    h = jnp.maximum(acc_f32 + bias_f32, 0.0)
    return h.astype(jnp.bfloat16)


def _critic_kernel(xu_ref, w1_ref, b1_ref,
                   w2a_ref, b2a_ref, w2b_ref, b2b_ref,
                   w3a_ref, w3b_ref, b3_ref,
                   out_ref, *, bf16_epilogue):
    """One batch tile: fused layer-1, per-head layer-2, split-contraction layer-3."""
    xu = xu_ref[...]                                   # (tile_m, in_pad) bf16

    # Fused layer 1 for both heads (head A -> lanes [0,H1P), head B -> [H1P,2*H1P)).
    h1 = _bias_relu(
        jnp.dot(xu, w1_ref[...], preferred_element_type=jnp.float32),
        b1_ref[...], bf16_epilogue)

    # Layer 2 stays per head (block-diagonalizing it would double its HBM bytes).
    # H1P is a multiple of 128, so these are aligned lane slices.
    h2a = _bias_relu(
        jnp.dot(h1[:, :H1P], w2a_ref[...], preferred_element_type=jnp.float32),
        b2a_ref[...], bf16_epilogue)
    h2b = _bias_relu(
        jnp.dot(h1[:, H1P:], w2b_ref[...], preferred_element_type=jnp.float32),
        b2b_ref[...], bf16_epilogue)

    # Fused layer 3 as a split contraction (no concatenate copy): both dots
    # target the same lane-dense (tile_m, 128) f32 block (col 0 = q1, col 1 = q2).
    out_ref[...] = (
        jnp.dot(h2a, w3a_ref[...], preferred_element_type=jnp.float32)
        + jnp.dot(h2b, w3b_ref[...], preferred_element_type=jnp.float32)
        + b3_ref[...])


def critic_forward(state, action, params):
    """Returns (q1, q2), each (B, 1) float32.  `params` from pack_critic_params."""
    B = state.shape[0]
    in_dim = state.shape[1] + action.shape[1]
    in_pad = params["w1"].shape[0]

    num_cores, bf16_epilogue = _chip_info()

    # Batch tiling: single tile for small batches on 1-TC chips; on v7x split
    # into >= num_cores tiles so "parallel" can shard across both TensorCores.
    if B <= MAX_TILE_M:
        if num_cores > 1:
            tile_m = _round_up(pl.cdiv(B, num_cores), 8)
        else:
            tile_m = _round_up(B, 8)
    else:
        tile_m = MAX_TILE_M
        if num_cores > 1 and _round_up(B, tile_m) // tile_m < num_cores:
            tile_m = 128
    b_pad = _round_up(B, tile_m)

    # Pack state+action into one lane-padded bf16 block (one input DMA per tile).
    xu = jnp.concatenate([state, action], axis=1).astype(jnp.bfloat16)
    xu = jnp.pad(xu, ((0, b_pad - B), (0, in_pad - in_dim)))

    def resident(shape):
        # Weights / biases: full array, same block for every grid step (VMEM-resident).
        return pl.BlockSpec(shape, lambda i: (0, 0))

    in_specs = [
        pl.BlockSpec((tile_m, in_pad), lambda i: (i, 0)),
        resident((in_pad, 2 * H1P)), resident((1, 2 * H1P)),
        resident((H1P, H2P)), resident((1, H2P)),
        resident((H1P, H2P)), resident((1, H2P)),
        resident((H2P, OUT_PAD)), resident((H2P, OUT_PAD)),
        resident((1, OUT_PAD)),
    ]
    out_specs = pl.BlockSpec((tile_m, OUT_PAD), lambda i: (i, 0))

    # Advisory cost for XLA's scheduler around this latency-bound kernel.
    flops = 2 * b_pad * (in_pad * 2 * H1P + 2 * H1P * H2P + 2 * H2P * OUT_PAD)
    param_bytes = sum(int(v.size) * v.dtype.itemsize for v in params.values())
    bytes_accessed = param_bytes + b_pad * (in_pad * 2 + OUT_PAD * 4)

    q_all = pl.pallas_call(
        functools.partial(_critic_kernel, bf16_epilogue=bf16_epilogue),
        out_shape=jax.ShapeDtypeStruct((b_pad, OUT_PAD), jnp.float32),
        grid=(b_pad // tile_m,),
        in_specs=in_specs,
        out_specs=out_specs,
        compiler_params=pltpu.CompilerParams(
            dimension_semantics=("parallel",)),
        cost_estimate=pl.CostEstimate(
            flops=flops, transcendentals=0, bytes_accessed=bytes_accessed),
    )(xu, params["w1"], params["b1"],
      params["w2a"], params["b2a"], params["w2b"], params["b2b"],
      params["w3a"], params["w3b"], params["b3"])

    q1 = q_all[:B, 0:1]
    q2 = q_all[:B, 1:2]
    return q1, q2


def init_critic_params(key, state_dim, action_dim):
    """PyTorch-style Linear init, U(-1/sqrt(fan_in), 1/sqrt(fan_in)), at the TRUE sizes.

    Weights stored (in_features, out_features); biases (1, out_features)."""
    in_dim = state_dim + action_dim
    dims = [(in_dim, H1), (H1, H2), (H2, 1)]
    params = {}
    for head in ("a", "b"):
        for li, (fi, fo) in enumerate(dims, start=1):
            key, kw, kb = jax.random.split(key, 3)
            bound = 1.0 / jnp.sqrt(jnp.float32(fi))
            params[f"w{li}{head}"] = jax.random.uniform(
                kw, (fi, fo), jnp.float32, -bound, bound)
            params[f"b{li}{head}"] = jax.random.uniform(
                kb, (1, fo), jnp.float32, -bound, bound)
    return params


def pack_critic_params(raw, state_dim, action_dim):
    """Pad to lane multiples, fuse heads for layers 1 & 3, cast weights to bf16."""
    in_dim = state_dim + action_dim
    in_pad = _round_up(in_dim, 128)

    def pad2(w, rows, cols):
        return jnp.pad(w, ((0, rows - w.shape[0]), (0, cols - w.shape[1])))

    bf16 = jnp.bfloat16

    # Fused layer 1: head A -> output columns [0, H1P), head B -> [H1P, 2*H1P).
    # Rows beyond in_dim (lane padding of xu) are zero -> mathematically inert.
    w1 = jnp.concatenate([pad2(raw["w1a"], in_pad, H1P),
                          pad2(raw["w1b"], in_pad, H1P)], axis=1)
    b1 = jnp.concatenate([pad2(raw["b1a"], 1, H1P),
                          pad2(raw["b1b"], 1, H1P)], axis=1)

    w2a = pad2(raw["w2a"], H1P, H2P)
    b2a = pad2(raw["b2a"], 1, H2P)
    w2b = pad2(raw["w2b"], H1P, H2P)
    b2b = pad2(raw["b2b"], 1, H2P)

    # Fused layer 3 as two (H2P, 128) lane-dense weights (split contraction in
    # the kernel): column 0 = q1, column 1 = q2, remaining lanes zero.
    w3a = jnp.zeros((H2P, OUT_PAD), jnp.float32).at[:H2, 0].set(raw["w3a"][:, 0])
    w3b = jnp.zeros((H2P, OUT_PAD), jnp.float32).at[:H2, 1].set(raw["w3b"][:, 0])
    b3 = jnp.zeros((1, OUT_PAD), jnp.float32)
    b3 = b3.at[0, 0].set(raw["b3a"][0, 0]).at[0, 1].set(raw["b3b"][0, 0])

    return {
        "w1": w1.astype(bf16), "b1": b1,
        "w2a": w2a.astype(bf16), "b2a": b2a,
        "w2b": w2b.astype(bf16), "b2b": b2b,
        "w3a": w3a.astype(bf16), "w3b": w3b.astype(bf16), "b3": b3,
    }


def _reference_forward(state, action, raw):
    """Plain-JAX reference modelling the kernel's bf16 weights AND bf16 activations
    (f32 accumulation).  Intentional precision difference vs. pure-f32 PyTorch."""
    def w(name):
        return raw[name].astype(jnp.bfloat16).astype(jnp.float32)

    def r(x):  # bf16 activation rounding between layers
        return x.astype(jnp.bfloat16).astype(jnp.float32)

    xu = r(jnp.concatenate([state, action], axis=1))

    def head(suf):
        h1 = r(jnp.maximum(xu @ w(f"w1{suf}") + raw[f"b1{suf}"], 0.0))
        h2 = r(jnp.maximum(h1 @ w(f"w2{suf}") + raw[f"b2{suf}"], 0.0))
        return h2 @ w(f"w3{suf}") + raw[f"b3{suf}"]

    return head("a"), head("b")


if __name__ == "__main__":
    state_dim, action_dim, batch = 12, 4, 8

    key = jax.random.PRNGKey(0)
    kp, ks, ka = jax.random.split(key, 3)

    raw_params = init_critic_params(kp, state_dim, action_dim)
    packed = pack_critic_params(raw_params, state_dim, action_dim)

    state = jax.random.normal(ks, (batch, state_dim), jnp.float32)
    action = jax.random.normal(ka, (batch, action_dim), jnp.float32)

    q1, q2 = jax.jit(critic_forward)(state, action, packed)
    jax.block_until_ready((q1, q2))

    r1, r2 = _reference_forward(state, action, raw_params)
    assert q1.shape == (batch, 1) and q2.shape == (batch, 1)
    # Kernel uses bf16 weights/activations with f32 accumulation.
    assert jnp.allclose(q1, r1, atol=2e-2, rtol=2e-2), (q1, r1)
    assert jnp.allclose(q2, r2, atol=2e-2, rtol=2e-2), (q2, r2)

    print("KERNEL_OK")
</pallas_src>

<mosaic_0001>
module attributes {stable_mosaic.version = 11 : i64} {
  func.func @_critic_kernel(%arg0: i32, %arg1: memref<8x128xbf16, #tpu.memory_space<vmem>>, %arg2: memref<128x1024xbf16, #tpu.memory_space<vmem>>, %arg3: memref<1x1024xf32, #tpu.memory_space<vmem>>, %arg4: memref<512x384xbf16, #tpu.memory_space<vmem>>, %arg5: memref<1x384xf32, #tpu.memory_space<vmem>>, %arg6: memref<512x384xbf16, #tpu.memory_space<vmem>>, %arg7: memref<1x384xf32, #tpu.memory_space<vmem>>, %arg8: memref<384x128xbf16, #tpu.memory_space<vmem>>, %arg9: memref<384x128xbf16, #tpu.memory_space<vmem>>, %arg10: memref<1x128xf32, #tpu.memory_space<vmem>>, %arg11: memref<8x128xf32, #tpu.memory_space<vmem>>) attributes {dimension_semantics = [#tpu.dimension_semantics<parallel>], iteration_bounds = array<i64: 1>, scalar_prefetch = 0 : i64, scratch_operands = 0 : i64, tpu.core_type = #tpu.core_type<tc>, window_params = [{transform_indices = @transform_0, window_bounds = array<i64: 8, 128>}, {pipeline_mode = #tpu.pipeline_mode<synchronous>, transform_indices = @transform_1, window_bounds = array<i64: 128, 1024>}, {pipeline_mode = #tpu.pipeline_mode<synchronous>, transform_indices = @transform_2, window_bounds = array<i64: 1, 1024>}, {pipeline_mode = #tpu.pipeline_mode<synchronous>, transform_indices = @transform_3, window_bounds = array<i64: 512, 384>}, {pipeline_mode = #tpu.pipeline_mode<synchronous>, transform_indices = @transform_4, window_bounds = array<i64: 1, 384>}, {pipeline_mode = #tpu.pipeline_mode<synchronous>, transform_indices = @transform_5, window_bounds = array<i64: 512, 384>}, {pipeline_mode = #tpu.pipeline_mode<synchronous>, transform_indices = @transform_6, window_bounds = array<i64: 1, 384>}, {pipeline_mode = #tpu.pipeline_mode<synchronous>, transform_indices = @transform_7, window_bounds = array<i64: 384, 128>}, {pipeline_mode = #tpu.pipeline_mode<synchronous>, transform_indices = @transform_8, window_bounds = array<i64: 384, 128>}, {pipeline_mode = #tpu.pipeline_mode<synchronous>, transform_indices = @transform_9, window_bounds = array<i64: 1, 128>}, {transform_indices = @transform_10, window_bounds = array<i64: 8, 128>}]} {
    %c0 = arith.constant 0 : index
    %c0_0 = arith.constant 0 : index
    %0 = vector.load %arg1[%c0, %c0_0] : memref<8x128xbf16, #tpu.memory_space<vmem>>, vector<8x128xbf16>
    %c0_1 = arith.constant 0 : index
    %c0_2 = arith.constant 0 : index
    %1 = vector.load %arg2[%c0_1, %c0_2] : memref<128x1024xbf16, #tpu.memory_space<vmem>>, vector<128x1024xbf16>
    %cst = arith.constant dense<0.000000e+00> : vector<8x1024xf32>
    %2 = tpu.matmul %0, %1, %cst {dimension_numbers = #tpu.dot_dimension_numbers<[1], [0], [0], [1], [0, 0, 1, 1], [], []>} : vector<8x128xbf16>, vector<128x1024xbf16>, vector<8x1024xf32> -> vector<8x1024xf32>
    %c0_3 = arith.constant 0 : index
    %c0_4 = arith.constant 0 : index
    %3 = vector.load %arg3[%c0_3, %c0_4] : memref<1x1024xf32, #tpu.memory_space<vmem>>, vector<1x1024xf32>
    %4 = arith.truncf %2 : vector<8x1024xf32> to vector<8x1024xbf16>
    %5 = arith.truncf %3 : vector<1x1024xf32> to vector<1x1024xbf16>
    %6 = vector.broadcast %5 : vector<1x1024xbf16> to vector<8x1024xbf16>
    %7 = arith.addf %4, %6 : vector<8x1024xbf16>
    %cst_5 = arith.constant 0.000000e+00 : bf16
    %8 = vector.broadcast %cst_5 : bf16 to vector<8x1024xbf16>
    %9 = arith.maximumf %7, %8 : vector<8x1024xbf16>
    %10 = vector.extract_strided_slice %9 {offsets = [0, 0], sizes = [8, 512], strides = [1, 1]} : vector<8x1024xbf16> to vector<8x512xbf16>
    %c0_6 = arith.constant 0 : index
    %c0_7 = arith.constant 0 : index
    %11 = vector.load %arg4[%c0_6, %c0_7] : memref<512x384xbf16, #tpu.memory_space<vmem>>, vector<512x384xbf16>
    %cst_8 = arith.constant dense<0.000000e+00> : vector<8x384xf32>
    %12 = tpu.matmul %10, %11, %cst_8 {dimension_numbers = #tpu.dot_dimension_numbers<[1], [0], [0], [1], [0, 0, 1, 1], [], []>} : vector<8x512xbf16>, vector<512x384xbf16>, vector<8x384xf32> -> vector<8x384xf32>
    %c0_9 = arith.constant 0 : index
    %c0_10 = arith.constant 0 : index
    %13 = vector.load %arg5[%c0_9, %c0_10] : memref<1x384xf32, #tpu.memory_space<vmem>>, vector<1x384xf32>
    %14 = arith.truncf %12 : vector<8x384xf32> to vector<8x384xbf16>
    %15 = arith.truncf %13 : vector<1x384xf32> to vector<1x384xbf16>
    %16 = vector.broadcast %15 : vector<1x384xbf16> to vector<8x384xbf16>
    %17 = arith.addf %14, %16 : vector<8x384xbf16>
    %cst_11 = arith.constant 0.000000e+00 : bf16
    %18 = vector.broadcast %cst_11 : bf16 to vector<8x384xbf16>
    %19 = arith.maximumf %17, %18 : vector<8x384xbf16>
    %20 = vector.extract_strided_slice %9 {offsets = [0, 512], sizes = [8, 512], strides = [1, 1]} : vector<8x1024xbf16> to vector<8x512xbf16>
    %c0_12 = arith.constant 0 : index
    %c0_13 = arith.constant 0 : index
    %21 = vector.load %arg6[%c0_12, %c0_13] : memref<512x384xbf16, #tpu.memory_space<vmem>>, vector<512x384xbf16>
    %cst_14 = arith.constant dense<0.000000e+00> : vector<8x384xf32>
    %22 = tpu.matmul %20, %21, %cst_14 {dimension_numbers = #tpu.dot_dimension_numbers<[1], [0], [0], [1], [0, 0, 1, 1], [], []>} : vector<8x512xbf16>, vector<512x384xbf16>, vector<8x384xf32> -> vector<8x384xf32>
    %c0_15 = arith.constant 0 : index
    %c0_16 = arith.constant 0 : index
    %23 = vector.load %arg7[%c0_15, %c0_16] : memref<1x384xf32, #tpu.memory_space<vmem>>, vector<1x384xf32>
    %24 = arith.truncf %22 : vector<8x384xf32> to vector<8x384xbf16>
    %25 = arith.truncf %23 : vector<1x384xf32> to vector<1x384xbf16>
    %26 = vector.broadcast %25 : vector<1x384xbf16> to vector<8x384xbf16>
    %27 = arith.addf %24, %26 : vector<8x384xbf16>
    %cst_17 = arith.constant 0.000000e+00 : bf16
    %28 = vector.broadcast %cst_17 : bf16 to vector<8x384xbf16>
    %29 = arith.maximumf %27, %28 : vector<8x384xbf16>
    %c0_18 = arith.constant 0 : index
    %c0_19 = arith.constant 0 : index
    %30 = vector.load %arg8[%c0_18, %c0_19] : memref<384x128xbf16, #tpu.memory_space<vmem>>, vector<384x128xbf16>
    %cst_20 = arith.constant dense<0.000000e+00> : vector<8x128xf32>
    %31 = tpu.matmul %19, %30, %cst_20 {dimension_numbers = #tpu.dot_dimension_numbers<[1], [0], [0], [1], [0, 0, 1, 1], [], []>} : vector<8x384xbf16>, vector<384x128xbf16>, vector<8x128xf32> -> vector<8x128xf32>
    %c0_21 = arith.constant 0 : index
    %c0_22 = arith.constant 0 : index
    %32 = vector.load %arg9[%c0_21, %c0_22] : memref<384x128xbf16, #tpu.memory_space<vmem>>, vector<384x128xbf16>
    %cst_23 = arith.constant dense<0.000000e+00> : vector<8x128xf32>
    %33 = tpu.matmul %29, %32, %cst_23 {dimension_numbers = #tpu.dot_dimension_numbers<[1], [0], [0], [1], [0, 0, 1, 1], [], []>} : vector<8x384xbf16>, vector<384x128xbf16>, vector<8x128xf32> -> vector<8x128xf32>
    %34 = arith.addf %31, %33 : vector<8x128xf32>
    %c0_24 = arith.constant 0 : index
    %c0_25 = arith.constant 0 : index
    %35 = vector.load %arg10[%c0_24, %c0_25] : memref<1x128xf32, #tpu.memory_space<vmem>>, vector<1x128xf32>
    %36 = vector.broadcast %35 : vector<1x128xf32> to vector<8x128xf32>
    %37 = arith.addf %34, %36 : vector<8x128xf32>
    %c0_26 = arith.constant 0 : index
    %c0_27 = arith.constant 0 : index
    %38 = vector.load %arg11[%c0_26, %c0_27] : memref<8x128xf32, #tpu.memory_space<vmem>>, vector<8x128xf32>
    tpu.vector_store %arg11[%c0_26, %c0_27], %37 {strides = array<i32>} : memref<8x128xf32, #tpu.memory_space<vmem>>, vector<8x128xf32>,
    return
  }
  func.func @transform_0(%arg0: i32) -> (i32, i32) {
    %c0_i32 = arith.constant 0 : i32
    %c0_i32_0 = arith.constant 0 : i32
    return %arg0, %c0_i32 : i32, i32
  }
  func.func @transform_1(%arg0: i32) -> (i32, i32) {
    %c0_i32 = arith.constant 0 : i32
    %c0_i32_0 = arith.constant 0 : i32
    %c0_i32_1 = arith.constant 0 : i32
    return %c0_i32, %c0_i32_0 : i32, i32
  }
  func.func @transform_2(%arg0: i32) -> (i32, i32) {
    %c0_i32 = arith.constant 0 : i32
    %c0_i32_0 = arith.constant 0 : i32
    %c0_i32_1 = arith.constant 0 : i32
    return %c0_i32, %c0_i32_0 : i32, i32
  }
  func.func @transform_3(%arg0: i32) -> (i32, i32) {
    %c0_i32 = arith.constant 0 : i32
    %c0_i32_0 = arith.constant 0 : i32
    %c0_i32_1 = arith.constant 0 : i32
    return %c0_i32, %c0_i32_0 : i32, i32
  }
  func.func @transform_4(%arg0: i32) -> (i32, i32) {
    %c0_i32 = arith.constant 0 : i32
    %c0_i32_0 = arith.constant 0 : i32
    %c0_i32_1 = arith.constant 0 : i32
    return %c0_i32, %c0_i32_0 : i32, i32
  }
  func.func @transform_5(%arg0: i32) -> (i32, i32) {
    %c0_i32 = arith.constant 0 : i32
    %c0_i32_0 = arith.constant 0 : i32
    %c0_i32_1 = arith.constant 0 : i32
    return %c0_i32, %c0_i32_0 : i32, i32
  }
  func.func @transform_6(%arg0: i32) -> (i32, i32) {
    %c0_i32 = arith.constant 0 : i32
    %c0_i32_0 = arith.constant 0 : i32
    %c0_i32_1 = arith.constant 0 : i32
    return %c0_i32, %c0_i32_0 : i32, i32
  }
  func.func @transform_7(%arg0: i32) -> (i32, i32) {
    %c0_i32 = arith.constant 0 : i32
    %c0_i32_0 = arith.constant 0 : i32
    %c0_i32_1 = arith.constant 0 : i32
    return %c0_i32, %c0_i32_0 : i32, i32
  }
  func.func @transform_8(%arg0: i32) -> (i32, i32) {
    %c0_i32 = arith.constant 0 : i32
    %c0_i32_0 = arith.constant 0 : i32
    %c0_i32_1 = arith.constant 0 : i32
    return %c0_i32, %c0_i32_0 : i32, i32
  }
  func.func @transform_9(%arg0: i32) -> (i32, i32) {
    %c0_i32 = arith.constant 0 : i32
    %c0_i32_0 = arith.constant 0 : i32
    %c0_i32_1 = arith.constant 0 : i32
    return %c0_i32, %c0_i32_0 : i32, i32
  }
  func.func @transform_10(%arg0: i32) -> (i32, i32) {
    %c0_i32 = arith.constant 0 : i32
    %c0_i32_0 = arith.constant 0 : i32
    return %arg0, %c0_i32 : i32, i32
  }
}

</mosaic_0001>

<bundles_post_ra>
// kernel: critic_forward.1
= control target key start
LH: loop header
LB: loop body
LE: loop exit
PB: predicated region body
PF: predicated region fallthrough
CT: control target
= control target key end

     0   :  { %15 = vsyncpa [#allocation3], 0  ;;  %s4277_s0 = inlined_call_operand.vmem [shape: bf16[8,128], index: 0, kind: input, shape index: {}]   ;;  %s4278_s1 = inlined_call_operand.hbm [shape: bf16[128,1024], index: 1, kind: input, shape index: {}]   ;;  %s4279_s2 = inlined_call_operand.vmem [shape: f32[1,1024], index: 2, kind: input, shape index: {}]   ;;  %s4280_s3 = inlined_call_operand.hbm [shape: bf16[512,384], index: 3, kind: input, shape index: {}]   ;;  %s4281_s4 = inlined_call_operand.vmem [shape: f32[1,384], index: 4, kind: input, shape index: {}]   ;;  %s4282_s5 = inlined_call_operand.hbm [shape: bf16[512,384], index: 5, kind: input, shape index: {}]   ;;  %s4283_s6 = inlined_call_operand.vmem [shape: f32[1,384], index: 6, kind: input, shape index: {}]   ;;  %s4284_s7 = inlined_call_operand.hbm [shape: bf16[384,128], index: 7, kind: input, shape index: {}]   ;;  %s4285_s8 = inlined_call_operand.hbm [shape: bf16[384,128], index: 8, kind: input, shape index: {}]   ;;  %s4286_s9 = inlined_call_operand.vmem [shape: f32[1,128], index: 9, kind: input, shape index: {}]   ;;  %s4287_s10 = inlined_call_operand.vmem [shape: f32[8,128], index: 10, kind: output, shape index: {}]  }
   0x1   :  { %16 = vsyncpa [#allocation5], 0 }
   0x2   :  { %17 = vsyncpa [#allocation8], 0  ;;  %s3984_s13 = smov [#allocation4]   ;;  %s3868_s17 = scalar_lea.hbm %s4280_s3, 12288 }
   0x3   :  { %s39_s14 = sshll.u32 %s3984_s13, 4  ;;  %p3869_p0 = scmp.ne.s32.totalorder %s4280_s3, %s3868_s17  ;;  %s40_s14 = int_to_ptr.vmem [resolvable:$true] %s39_s14 }
   0x4   :  { %p3872_p1 = scmp.lt.u32.totalorder %s3868_s17, %s4280_s3 }
   0x6   :  { %p3874_p2 = pnand %p3872_p1, %p3869_p0 }
   0x8   :  { %3877 = shalt.err (!%p3874_p2)
}
   0x9   :  { %s3878_s22 = scalar_lea.vmem %s40_s14, 12288  ;;  %p3883_p4 = scmp.lt.s32.totalorder %s40_s14, %s40_s14 }
   0xa   :  { %p3879_p3 = scmp.ne.s32.totalorder %s40_s14, %s3878_s22  ;;  %p3884_p5 = scmp.lt.s32.totalorder %s3878_s22, %s3878_s22 }
   0xc   :  { %p3885_p6 = por %p3884_p5, %p3883_p4 }
   0xe   :  { %p3886_p7 = pnand %p3885_p6, %p3879_p3 }
  0x10   :  { %3889 = shalt.err (!%p3886_p7)
}
  0x11   :  { %s3985_s23 = smov 192   ;;  %s3986_s24 = smov 12  }
  0x12   :  { %45 = dma.hbm_to_vmem [thread:$0]  %s4280_s3, 12288, %s40_s14, [#allocation5], %s3985_s23, %s3985_s23, %s3986_s24  }
  0x13   :  { %s3987_s27 = smov [#allocation7]   ;;  %s3890_s11 = scalar_lea.hbm %s4284_s7, 3072 }
  0x14   :  { %s67_s28 = sshll.u32 %s3987_s27, 4  ;;  %p3891_p8 = scmp.ne.s32.totalorder %s4284_s7, %s3890_s11  ;;  %s68_s28 = int_to_ptr.vmem [resolvable:$true] %s67_s28 }
  0x15   :  { %p3894_p9 = scmp.lt.u32.totalorder %s3890_s11, %s4284_s7 }
  0x17   :  { %p3896_p10 = pnand %p3894_p9, %p3891_p8 }
  0x19   :  { %3899 = shalt.err (!%p3896_p10)
}
  0x1a   :  { %s3900_s17 = scalar_lea.vmem %s68_s28, 3072  ;;  %p3905_p12 = scmp.lt.s32.totalorder %s68_s28, %s68_s28 }
  0x1b   :  { %p3901_p11 = scmp.ne.s32.totalorder %s68_s28, %s3900_s17  ;;  %p3906_p13 = scmp.lt.s32.totalorder %s3900_s17, %s3900_s17 }
  0x1d   :  { %p3907_p0 = por %p3906_p13, %p3905_p12 }
  0x1f   :  { %p3908_p1 = pnand %p3907_p0, %p3901_p11 }
  0x21   :  { %3911 = shalt.err (!%p3908_p1)
}
  0x22   :  { %s3988_s3 = smov 64   ;;  %s3989_s14 = smov 4  }
  0x23   :  { %73 = dma.hbm_to_vmem [thread:$0]  %s4284_s7, 3072, %s68_s28, [#allocation8], %s3988_s3, %s3988_s3, %s3989_s14  }
  0x24   :  { %s3990_s20 = smov [#allocation2]   ;;  %s3912_s26 = scalar_lea.hbm %s4278_s1, 8192 }
  0x25   :  { %s25_s21 = sshll.u32 %s3990_s20, 4  ;;  %p3913_p2 = scmp.ne.s32.totalorder %s4278_s1, %s3912_s26  ;;  %s26_s21 = int_to_ptr.vmem [resolvable:$true] %s25_s21 }
  0x26   :  { %p3916_p3 = scmp.lt.u32.totalorder %s3912_s26, %s4278_s1 }
  0x28   :  { %p3918_p4 = pnand %p3916_p3, %p3913_p2 }
  0x2a   :  { %3921 = shalt.err (!%p3918_p4)
}
  0x2b   :  { %s3922_s12 = scalar_lea.vmem %s26_s21, 8192  ;;  %p3927_p6 = scmp.lt.s32.totalorder %s26_s21, %s26_s21 }
  0x2c   :  { %p3923_p5 = scmp.ne.s32.totalorder %s26_s21, %s3922_s12  ;;  %p3928_p7 = scmp.lt.s32.totalorder %s3922_s12, %s3922_s12 }
  0x2e   :  { %p3929_p8 = por %p3928_p7, %p3927_p6 }
  0x30   :  { %p3930_p9 = pnand %p3929_p8, %p3923_p5 }
  0x32   :  { %3933 = shalt.err (!%p3930_p9)
}
  0x33   :  { %s3991_s7 = smov 512   ;;  %s3992_s28 = smov 32  }
  0x34   :  { %31 = dma.hbm_to_vmem [thread:$0]  %s4278_s1, 8192, %s26_s21, [#allocation3], %s3991_s7, %s3991_s7, %s3992_s28  }
  0x35   :  { %s3993_s16 = smov [#allocation6]   ;;  %s3994_s18 = smov [#allocation9]  }
  0x36   :  { %s53_s17 = sshll.u32 %s3993_s16, 4  ;;  %s79_s19 = sshll.u32 %s3994_s18, 4  ;;  %s54_s17 = int_to_ptr.vmem [resolvable:$true] %s53_s17  ;;  %s80_s19 = int_to_ptr.vmem [resolvable:$true] %s79_s19 }
  0x37   :  { %s3934_s25 = scalar_lea.hbm %s4282_s5, 12288 }
  0x38   :  { %p3935_p10 = scmp.ne.s32.totalorder %s4282_s5, %s3934_s25  ;;  %p3938_p11 = scmp.lt.u32.totalorder %s3934_s25, %s4282_s5 }
  0x3a   :  { %p3940_p12 = pnand %p3938_p11, %p3935_p10 }
  0x3c   :  { %3943 = shalt.err (!%p3940_p12)
}
  0x3d   :  { %s3944_s1 = scalar_lea.vmem %s54_s17, 12288  ;;  %p3949_p0 = scmp.lt.s32.totalorder %s54_s17, %s54_s17 }
  0x3e   :  { %p3945_p13 = scmp.ne.s32.totalorder %s54_s17, %s3944_s1  ;;  %p3950_p1 = scmp.lt.s32.totalorder %s3944_s1, %s3944_s1 }
  0x40   :  { %p3951_p2 = por %p3950_p1, %p3949_p0 }
  0x42   :  { %p3952_p3 = pnand %p3951_p2, %p3945_p13 }
  0x44   :  { %3955 = shalt.err (!%p3952_p3)
}
  0x45   :  { %59 = dma.hbm_to_vmem [thread:$0]  %s4282_s5, 12288, %s54_s17, [#allocation5], %s3985_s23, %s3985_s23, %s3986_s24  }
  0x46   :  { %s3956_s28 = scalar_lea.hbm %s4285_s8, 3072 }
  0x47   :  { %p3957_p4 = scmp.ne.s32.totalorder %s4285_s8, %s3956_s28  ;;  %p3960_p5 = scmp.lt.u32.totalorder %s3956_s28, %s4285_s8 }
  0x49   :  { %p3962_p6 = pnand %p3960_p5, %p3957_p4 }
  0x4b   :  { %3965 = shalt.err (!%p3962_p6)
}
  0x4c   :  { %s3966_s20 = scalar_lea.vmem %s80_s19, 3072  ;;  %p3971_p8 = scmp.lt.s32.totalorder %s80_s19, %s80_s19 }
  0x4d   :  { %p3967_p7 = scmp.ne.s32.totalorder %s80_s19, %s3966_s20  ;;  %p3972_p9 = scmp.lt.s32.totalorder %s3966_s20, %s3966_s20 }
  0x4f   :  { %p3973_p10 = por %p3972_p9, %p3971_p8 }
  0x51   :  { %p3974_p11 = pnand %p3973_p10, %p3967_p7 }
  0x53   :  { %3977 = shalt.err (!%p3974_p11)
}
  0x54   :  { %85 = dma.hbm_to_vmem [thread:$0]  %s4285_s8, 3072, %s80_s19, [#allocation8], %s3988_s3, %s3988_s3, %s3989_s14  }
  0x55   :  { %3978 = dma.done.wait [#allocation3], 8192  }
  0x56   :  { %3979 = vsyncadd [#allocation3], 4294959104 }
  0x57   :  { %3980 = dma.done.wait [#allocation5], 24576  }
  0x58   :  { %3981 = vsyncadd [#allocation5], 4294942720 }
  0x59   :  { %3982 = dma.done.wait [#allocation8], 6144  }
  0x5a   :  { %3983 = vsyncadd [#allocation8], 4294961152  ;;  %v3995_v0 = vmov 0   ;;  %v105_v1 = vld [vmem:[#allocation2] sm:$0xff]  ;;  %v106_v13 = vld [vmem:[#allocation2 + $0x8] sm:$0xff]  ;;  %vm3997_vm0 = vmmov 0  }
  0x5b   :  { %521 = vmatprep.mubr.bf16.mxu0 %v3995_v0  ;;  %562 = vmatprep.mubr.bf16.mxu1 %v3995_v0  ;;  %v109_v2 = vld [vmem:[#allocation2 + $0x20] sm:$0xff]  ;;  %v110_v14 = vld [vmem:[#allocation2 + $0x28] sm:$0xff]  ;;  %v107_v60 = vld [vmem:[#allocation2 + $0x10] sm:$0xff] }
  0x5c   :  { %v113_v3 = vld [vmem:[#allocation2 + $0x40] sm:$0xff]  ;;  %v3048_v4 = vcombine.high %v105_v1, %v109_v2  ;;  %v3047_v5 = vcombine.low %v105_v1, %v109_v2  ;;  %v3050_v16 = vcombine.high %v106_v13, %v110_v14  ;;  %v3049_v17 = vcombine.low %v106_v13, %v110_v14  ;;  %v114_v18 = vld [vmem:[#allocation2 + $0x48] sm:$0xff]  ;;  %v111_v61 = vld [vmem:[#allocation2 + $0x30] sm:$0xff] }
  0x5d   :  { %v117_v6 = vld [vmem:[#allocation2 + $0x60] sm:$0xff]  ;;  %v118_v19 = vld [vmem:[#allocation2 + $0x68] sm:$0xff]  ;;  %v3052_v2 = vcombine.high %v107_v60, %v111_v61  ;;  %v127_v13 = vld [vmem:[#allocation2 + $0xb0] sm:$0xff] }
  0x5e   :  { %v3056_v7 = vcombine.high %v113_v3, %v117_v6  ;;  %v121_v8 = vld [vmem:[#allocation2 + $0x80] sm:$0xff]  ;;  %489 = vmatprep.subr.bf16.mxu0 %v3048_v4  ;;  %v3055_v10 = vcombine.low %v113_v3, %v117_v6  ;;  %v3058_v20 = vcombine.high %v114_v18, %v118_v19  ;;  %v122_v21 = vld [vmem:[#allocation2 + $0x88] sm:$0xff]  ;;  %530 = vmatprep.subr.bf16.mxu1 %v3050_v16  ;;  %v115_v3 = vld [vmem:[#allocation2 + $0x50] sm:$0xff] }
  0x5f   :  { %v125_v9 = vld [vmem:[#allocation2 + $0xa0] sm:$0xff]  ;;  %490 = vmatpush1.bf16.msra.mxu0 %v3047_v5  ;;  %v126_v22 = vld [vmem:[#allocation2 + $0xa8] sm:$0xff]  ;;  %531 = vmatpush1.bf16.msra.mxu1 %v3049_v17  ;;  %v3057_v25 = vcombine.low %v114_v18, %v118_v19  ;;  %v119_v5 = vld [vmem:[#allocation2 + $0x70] sm:$0xff] }
  0x60   :  { %491 = vmatprep.subr.bf16.mxu0 %v3056_v7  ;;  %v3064_v11 = vcombine.high %v121_v8, %v125_v9  ;;  %v129_v12 = vld [vmem:[#allocation2 + $0xc0] sm:$0xff]  ;;  %v3063_v23 = vcombine.low %v121_v8, %v125_v9  ;;  %532 = vmatprep.subr.bf16.mxu1 %v3058_v20  ;;  %v3066_v28 = vcombine.high %v122_v21, %v126_v22  ;;  %v130_v29 = vld [vmem:[#allocation2 + $0xc8] sm:$0xff]  ;;  %v108_v6 = vld [vmem:[#allocation2 + $0x18] sm:$0xff] }
  0x61   :  { %v133_v15 = vld [vmem:[#allocation2 + $0xe0] sm:$0xff]  ;;  %v134_v30 = vld [vmem:[#allocation2 + $0xe8] sm:$0xff]  ;;  %v3065_v33 = vcombine.low %v122_v21, %v126_v22  ;;  %v112_v7 = vld [vmem:[#allocation2 + $0x38] sm:$0xff]  ;;  %v3051_v9 = vcombine.low %v107_v60, %v111_v61  ;;  %v3059_v17 = vcombine.low %v115_v3, %v119_v5 }
  0x62   :  { %v3072_v24 = vcombine.high %v129_v12, %v133_v15  ;;  %v137_v26 = vld [vmem:[#allocation2 + $0x100] sm:$0xff]  ;;  %v3071_v31 = vcombine.low %v129_v12, %v133_v15  ;;  %v3074_v36 = vcombine.high %v130_v29, %v134_v30  ;;  %v138_v37 = vld [vmem:[#allocation2 + $0x108] sm:$0xff]  ;;  %v3073_v41 = vcombine.low %v130_v29, %v134_v30  ;;  %v123_v12 = vld [vmem:[#allocation2 + $0x90] sm:$0xff] }
  0x63   :  { %492 = vmatpush1.bf16.msra.mxu0 %v3055_v10  ;;  %v141_v27 = vld [vmem:[#allocation2 + $0x120] sm:$0xff]  ;;  %533 = vmatpush1.bf16.msra.mxu1 %v3057_v25  ;;  %v142_v38 = vld [vmem:[#allocation2 + $0x128] sm:$0xff]  ;;  %v3054_v14 = vcombine.high %v108_v6, %v112_v7  ;;  %v116_v15 = vld [vmem:[#allocation2 + $0x58] sm:$0xff]  ;;  %v3068_v19 = vcombine.high %v123_v12, %v127_v13  ;;  %v3053_v21 = vcombine.low %v108_v6, %v112_v7 }
  0x64   :  { %493 = vmatprep.subr.bf16.mxu0 %v3064_v11  ;;  %v3080_v32 = vcombine.high %v137_v26, %v141_v27  ;;  %v145_v34 = vld [vmem:[#allocation2 + $0x140] sm:$0xff]  ;;  %534 = vmatprep.subr.bf16.mxu1 %v3066_v28  ;;  %v3079_v39 = vcombine.low %v137_v26, %v141_v27  ;;  %v3082_v44 = vcombine.high %v138_v37, %v142_v38  ;;  %v146_v45 = vld [vmem:[#allocation2 + $0x148] sm:$0xff]  ;;  %v120_v16 = vld [vmem:[#allocation2 + $0x78] sm:$0xff] }
  0x65   :  { %v149_v35 = vld [vmem:[#allocation2 + $0x160] sm:$0xff]  ;;  %v150_v46 = vld [vmem:[#allocation2 + $0x168] sm:$0xff]  ;;  %v3081_v50 = vcombine.low %v138_v37, %v142_v38  ;;  %v3060_v11 = vcombine.high %v115_v3, %v119_v5  ;;  %v131_v18 = vld [vmem:[#allocation2 + $0xd0] sm:$0xff]  ;;  %v3062_v22 = vcombine.high %v116_v15, %v120_v16  ;;  %v3067_v25 = vcombine.low %v123_v12, %v127_v13 }
  0x66   :  { %v3088_v40 = vcombine.high %v145_v34, %v149_v35  ;;  %v153_v42 = vld [vmem:[#allocation2 + $0x180] sm:$0xff]  ;;  %v3087_v47 = vcombine.low %v145_v34, %v149_v35  ;;  %v3090_v52 = vcombine.high %v146_v45, %v150_v46  ;;  %v154_v53 = vld [vmem:[#allocation2 + $0x188] sm:$0xff]  ;;  %v3089_v57 = vcombine.low %v146_v45, %v150_v46  ;;  %v135_v20 = vld [vmem:[#allocation2 + $0xf0] sm:$0xff] }
  0x67   :  { %494 = vmatpush1.bf16.msra.mxu0 %v3063_v23  ;;  %535 = vmatpush1.bf16.msra.mxu1 %v3065_v33  ;;  %v157_v43 = vld [vmem:[#allocation2 + $0x1a0] sm:$0xff]  ;;  %v158_v54 = vld [vmem:[#allocation2 + $0x1a8] sm:$0xff]  ;;  %v124_v23 = vld [vmem:[#allocation2 + $0x98] sm:$0xff]  ;;  %v3076_v26 = vcombine.high %v131_v18, %v135_v20  ;;  %v3061_v28 = vcombine.low %v116_v15, %v120_v16  ;;  %v3075_v33 = vcombine.low %v131_v18, %v135_v20 }
  0x68   :  { %495 = vmatprep.subr.bf16.mxu0 %v3072_v24  ;;  %536 = vmatprep.subr.bf16.mxu1 %v3074_v36  ;;  %v3096_v48 = vcombine.high %v153_v42, %v157_v43  ;;  %v161_v49 = vld [vmem:[#allocation2 + $0x1c0] sm:$0xff]  ;;  %v3095_v55 = vcombine.low %v153_v42, %v157_v43  ;;  %v162_v58 = vld [vmem:[#allocation2 + $0x1c8] sm:$0xff]  ;;  %v3098_v59 = vcombine.high %v154_v53, %v158_v54  ;;  %v128_v24 = vld [vmem:[#allocation2 + $0xb8] sm:$0xff] }
  0x69   :  { %v165_v51 = vld [vmem:[#allocation2 + $0x1e0] sm:$0xff]  ;;  %v166_v62 = vld [vmem:[#allocation2 + $0x1e8] sm:$0xff]  ;;  %v3097_v1 = vcombine.low %v154_v53, %v158_v54  ;;  %v139_v27 = vld [vmem:[#allocation2 + $0x110] sm:$0xff]  ;;  %v3070_v30 = vcombine.high %v124_v23, %v128_v24  ;;  %v3069_v36 = vcombine.low %v124_v23, %v128_v24 }
  0x6a   :  { %v3104_v56 = vcombine.high %v161_v49, %v165_v51  ;;  %v3103_v63 = vcombine.low %v161_v49, %v165_v51  ;;  %v3106_v4 = vcombine.high %v162_v58, %v166_v62  ;;  %v4130_v8 = vld [vmem:[%s4277_s0] sm:$0xf]  ;;  %v3105_v10 = vcombine.low %v162_v58, %v166_v62  ;;  %v143_v29 = vld [vmem:[#allocation2 + $0x130] sm:$0xff]  ;;  %v156_v54 = vld [vmem:[#allocation2 + $0x198] sm:$0xff] }
  0x6b   :  { %496 = vmatpush1.bf16.msra.mxu0 %v3071_v31  ;;  %537 = vmatpush1.bf16.msra.mxu1 %v3073_v41  ;;  %v132_v31 = vld [vmem:[#allocation2 + $0xd8] sm:$0xff]  ;;  %v3084_v34 = vcombine.high %v139_v27, %v143_v29  ;;  %v147_v35 = vld [vmem:[#allocation2 + $0x150] sm:$0xff]  ;;  %v3083_v41 = vcombine.low %v139_v27, %v143_v29  ;;  %v3596_v12 = vld [vmem:[#allocation4 + $0xe0] ss:$12 sps:$4 sm:$0xff]  }
  0x6c   :  { %497 = vmatprep.subr.bf16.mxu0 %v3080_v32  ;;  %538 = vmatprep.subr.bf16.mxu1 %v3082_v44  ;;  %v136_v32 = vld [vmem:[#allocation2 + $0xf8] sm:$0xff]  ;;  %v151_v37 = vld [vmem:[#allocation2 + $0x170] sm:$0xff]  ;;  %v3597_v15 = vld [vmem:[#allocation4 + $0x20] ss:$12 sps:$4 sm:$0xff]  }
  0x6d   :  { %v3078_v38 = vcombine.high %v132_v31, %v136_v32  ;;  %v155_v42 = vld [vmem:[#allocation2 + $0x190] sm:$0xff]  ;;  %v3092_v43 = vcombine.high %v147_v35, %v151_v37  ;;  %v3077_v45 = vcombine.low %v132_v31, %v136_v32  ;;  %v3091_v49 = vcombine.low %v147_v35, %v151_v37  ;;  %v164_v60 = vld [vmem:[#allocation2 + $0x1d8] sm:$0xff]  ;;  %v3616_v27 = vld [vmem:[#allocation4 + $0x140] ss:$12 sps:$4 sm:$0xff]  }
  0x6e   :  { %v159_v44 = vld [vmem:[#allocation2 + $0x1b0] sm:$0xff]  ;;  %v168_v61 = vld [vmem:[#allocation2 + $0x1f8] sm:$0xff] }
  0x6f   :  { %498 = vmatpush1.bf16.msra.mxu0 %v3079_v39  ;;  %539 = vmatpush1.bf16.msra.mxu1 %v3081_v50  ;;  %v140_v39 = vld [vmem:[#allocation2 + $0x118] sm:$0xff]  ;;  %v163_v50 = vld [vmem:[#allocation2 + $0x1d0] sm:$0xff]  ;;  %v3110_v3 = vcombine.high %v164_v60, %v168_v61  ;;  %v3109_v7 = vcombine.low %v164_v60, %v168_v61 }
  0x70   :  { %499 = vmatprep.subr.bf16.mxu0 %v3088_v40  ;;  %540 = vmatprep.subr.bf16.mxu1 %v3090_v52  ;;  %v144_v40 = vld [vmem:[#allocation2 + $0x138] sm:$0xff]  ;;  %v167_v51 = vld [vmem:[#allocation2 + $0x1f0] sm:$0xff]  ;;  %v3100_v52 = vcombine.high %v155_v42, %v159_v44 }
  0x71   :  { %v3086_v46 = vcombine.high %v140_v39, %v144_v40  ;;  %v3085_v53 = vcombine.low %v140_v39, %v144_v40  ;;  %v3108_v58 = vcombine.high %v163_v50, %v167_v51  ;;  %v3569_v5 = vld [vmem:[#allocation4 + $0x1c] ss:$12 sps:$4 sm:$0xff]   ;;  %v3601_v16 = vld [vmem:[#allocation4 + $0xf8] ss:$12 sps:$4 sm:$0xff]  }
  0x72   :  { %v3591_v6 = vld [vmem:[#allocation4 + $0xc8] ss:$12 sps:$4 sm:$0xff]   ;;  %v3570_v13 = vld [vmem:[#allocation4 + $0x30] ss:$12 sps:$4 sm:$0xff]   ;;  %v3587_v29 = vld [vmem:[#allocation4 + $0xac] ss:$12 sps:$4 sm:$0xff]  }
  0x73   :  { %500 = vmatpush1.bf16.msra.mxu0 %v3087_v47  ;;  %541 = vmatpush1.bf16.msra.mxu1 %v3089_v57  ;;  %v148_v47 = vld [vmem:[#allocation2 + $0x158] sm:$0xff]  ;;  %v3099_v57 = vcombine.low %v155_v42, %v159_v44  ;;  %v3578_v18 = vld [vmem:[#allocation4 + $0x64] ss:$12 sps:$4 sm:$0xff]   ;;  %v3611_v24 = vld [vmem:[#allocation4 + $0x128] ss:$12 sps:$4 sm:$0xff]  }
  0x74   :  { %501 = vmatprep.subr.bf16.mxu0 %v3096_v48  ;;  %542 = vmatprep.subr.bf16.mxu1 %v3098_v59  ;;  %v152_v48 = vld [vmem:[#allocation2 + $0x178] sm:$0xff]  ;;  %v3585_v31 = vld [vmem:[#allocation4 + $0xa8] ss:$12 sps:$4 sm:$0xff]   ;;  %v3590_v32 = vld [vmem:[#allocation4 + $0xc4] ss:$12 sps:$4 sm:$0xff]  }
  0x75   :  { %v3093_v59 = vcombine.low %v148_v47, %v152_v48  ;;  %v3606_v20 = vld [vmem:[#allocation4 + $0x110] ss:$12 sps:$4 sm:$0xff]   ;;  %v3593_v35 = vld [vmem:[#allocation4 + $0xd8] ss:$12 sps:$4 sm:$0xff]   ;;  %v3603_v39 = vld [vmem:[#allocation4 + $0x108] ss:$12 sps:$4 sm:$0xff]  }
  0x76   :  { %v3607_v23 = vld [vmem:[#allocation4 + $0x50] ss:$12 sps:$4 sm:$0xff]   ;;  %v3621_v44 = vld [vmem:[#allocation4 + $0x158] ss:$12 sps:$4 sm:$0xff]  }
  0x77   :  { %502 = vmatpush1.bf16.msra.mxu0 %v3095_v55  ;;  %543 = vmatpush1.bf16.msra.mxu1 %v3097_v1  ;;  %v160_v55 = vld [vmem:[#allocation2 + $0x1b8] sm:$0xff]  ;;  %v3107_v1 = vcombine.low %v163_v50, %v167_v51  ;;  %v3610_v40 = vld [vmem:[#allocation4 + $0x124] ss:$12 sps:$4 sm:$0xff]   ;;  %v3623_v51 = vld [vmem:[#allocation4 + $0x168] ss:$12 sps:$4 sm:$0xff]  }
  0x78   :  { %503 = vmatprep.subr.bf16.mxu0 %v3104_v56  ;;  %544 = vmatprep.subr.bf16.mxu1 %v3106_v4  ;;  %v3094_v56 = vcombine.high %v148_v47, %v152_v48  ;;  %v3102_v62 = vcombine.high %v156_v54, %v160_v55  ;;  %v3564_v4 = vld [vmem:[#allocation4] ss:$12 sps:$4 sm:$0xff]   ;;  %v3598_v37 = vld [vmem:[#allocation4 + $0xf0] ss:$12 sps:$4 sm:$0xff]  }
  0x79   :  { %v3615_v42 = vld [vmem:[#allocation4 + $0x13c] ss:$12 sps:$4 sm:$0xff]  }
  0x7a   :  { %v3618_v47 = vld [vmem:[#allocation4 + $0x150] ss:$12 sps:$4 sm:$0xff]  }
  0x7b   :  { %504 = vmatpush1.bf16.msra.mxu0 %v3103_v63  ;;  %545 = vmatpush1.bf16.msra.mxu1 %v3105_v10  ;;  %v3566_v63 = vld [vmem:[#allocation4 + $0x4] ss:$12 sps:$4 sm:$0xff]   ;;  %v3572_v10 = vld [vmem:[#allocation4 + $0x34] ss:$12 sps:$4 sm:$0xff]  }
  0x7c   :  { %571 = vmatprep.subr.bf16.mxu0 %v3052_v2  ;;  %612 = vmatprep.subr.bf16.mxu1 %v3054_v14  ;;  %v3101_v2 = vcombine.low %v156_v54, %v160_v55  ;;  %v3575_v14 = vld [vmem:[#allocation4 + $0x4c] ss:$12 sps:$4 sm:$0xff]   ;;  %v3626_v48 = vld [vmem:[#allocation4 + $0x170] ss:$12 sps:$4 sm:$0xff]   ;;  %v663_v54 = vlaneseq }
  0x7d   :  { %v3627_v50 = vld [vmem:[#allocation4 + $0xb0] ss:$12 sps:$4 sm:$0xff]  }
  0x7e   :  { %522 = vmatmul.mubr.bf16.vlgmr.msra.gmra.mrb[0].mxu0 %v4130_v8  ;;  %563 = vmatmul.mubr.bf16.vlgmr.msra.gmra.mrb[0].mxu1 %v4130_v8  ;;  %v4138_v55 = vshrl.u32 %v663_v54, 7  ;;  %v3657_v54 = vld [vmem:[#allocation4 + $0x200] ss:$12 sps:$4 sm:$0xff]  }
  0x7f   :  { %572 = vmatpush1.bf16.msra.mxu0 %v3051_v9  ;;  %603 = vmatprep.mubr.bf16.mxu0 %v3995_v0  ;;  %v3567_v9 = vld [vmem:[#allocation4 + $0x18] ss:$12 sps:$4 sm:$0xff]  }
  0x80   :  { %573 = vmatprep.subr.bf16.mxu0 %v3060_v11  ;;  %613 = vmatpush1.bf16.msra.mxu1 %v3053_v21  ;;  %v3592_v11 = vld [vmem:[#allocation4 + $0x8] ss:$12 sps:$4 sm:$0xff]   ;;  %v3576_v21 = vld [vmem:[#allocation4 + $0x60] ss:$12 sps:$4 sm:$0xff]   ;;  %v677_v61 = vsub.s32 3, %v4138_v55 }
  0x81   :  { %614 = vmatprep.subr.bf16.mxu1 %v3062_v22  ;;  %644 = vmatprep.mubr.bf16.mxu1 %v3995_v0  ;;  %v3581_v22 = vld [vmem:[#allocation4 + $0x7c] ss:$12 sps:$4 sm:$0xff]  }
  0x83   :  { %574 = vmatpush1.bf16.msra.mxu0 %v3059_v17  ;;  %v3573_v17 = vld [vmem:[#allocation4 + $0x48] ss:$12 sps:$4 sm:$0xff]  }
  0x84   :  { %575 = vmatprep.subr.bf16.mxu0 %v3068_v19  ;;  %615 = vmatpush1.bf16.msra.mxu1 %v3061_v28  ;;  %v3602_v19 = vld [vmem:[#allocation4 + $0x38] ss:$12 sps:$4 sm:$0xff]   ;;  %v3582_v28 = vld [vmem:[#allocation4 + $0x90] ss:$12 sps:$4 sm:$0xff]  }
  0x85   :  { %616 = vmatprep.subr.bf16.mxu1 %v3070_v30  ;;  %v3617_v30 = vld [vmem:[#allocation4 + $0x80] ss:$12 sps:$4 sm:$0xff]  }
  0x87   :  { %576 = vmatpush1.bf16.msra.mxu0 %v3067_v25  ;;  %v3584_v25 = vld [vmem:[#allocation4 + $0x94] ss:$12 sps:$4 sm:$0xff]  }
  0x88   :  { %577 = vmatprep.subr.bf16.mxu0 %v3076_v26  ;;  %617 = vmatpush1.bf16.msra.mxu1 %v3069_v36  ;;  %v3612_v26 = vld [vmem:[#allocation4 + $0x68] ss:$12 sps:$4 sm:$0xff]  }
  0x89   :  { %618 = vmatprep.subr.bf16.mxu1 %v3078_v38  ;;  %v3600_v36 = vld [vmem:[#allocation4 + $0xf4] ss:$12 sps:$4 sm:$0xff]   ;;  %v3605_v38 = vld [vmem:[#allocation4 + $0x10c] ss:$12 sps:$4 sm:$0xff]  }
  0x8b   :  { %578 = vmatpush1.bf16.msra.mxu0 %v3075_v33  ;;  %v3588_v33 = vld [vmem:[#allocation4 + $0xc0] ss:$12 sps:$4 sm:$0xff]  }
  0x8c   :  { %579 = vmatprep.subr.bf16.mxu0 %v3084_v34  ;;  %619 = vmatpush1.bf16.msra.mxu1 %v3077_v45  ;;  %v3595_v34 = vld [vmem:[#allocation4 + $0xdc] ss:$12 sps:$4 sm:$0xff]   ;;  %v3620_v45 = vld [vmem:[#allocation4 + $0x154] ss:$12 sps:$4 sm:$0xff]  }
  0x8d   :  { %620 = vmatprep.subr.bf16.mxu1 %v3086_v46  ;;  %v3622_v46 = vld [vmem:[#allocation4 + $0x98] ss:$12 sps:$4 sm:$0xff]  }
  0x8f   :  { %580 = vmatpush1.bf16.msra.mxu0 %v3083_v41  ;;  %v3608_v41 = vld [vmem:[#allocation4 + $0x120] ss:$12 sps:$4 sm:$0xff]  }
  0x90   :  { %581 = vmatprep.subr.bf16.mxu0 %v3092_v43  ;;  %621 = vmatpush1.bf16.msra.mxu1 %v3085_v53  ;;  %v3613_v43 = vld [vmem:[#allocation4 + $0x138] ss:$12 sps:$4 sm:$0xff]  }
  0x91   :  { %622 = vmatprep.subr.bf16.mxu1 %v3094_v56  ;;  %v3630_v53 = vld [vmem:[#allocation4 + $0x184] ss:$12 sps:$4 sm:$0xff]   ;;  %v4141_v56 = vsub.s32 0, %v4138_v55 }
  0x93   :  { %582 = vmatpush1.bf16.msra.mxu0 %v3091_v49  ;;  %v3625_v49 = vld [vmem:[#allocation4 + $0x16c] ss:$12 sps:$4 sm:$0xff]  }
  0x94   :  { %583 = vmatprep.subr.bf16.mxu0 %v3100_v52  ;;  %623 = vmatpush1.bf16.msra.mxu1 %v3093_v59  ;;  %v3631_v52 = vld [vmem:[#allocation4 + $0x248] ss:$12 sps:$4 sm:$0xff]  }
  0x95   :  { %624 = vmatprep.subr.bf16.mxu1 %v3102_v62 }
  0x97   :  { %584 = vmatpush1.bf16.msra.mxu0 %v3099_v57  ;;  %v4146_v57 = vld [vmem:[%s4279_s2] sm:$0xff] }
  0x98   :  { %585 = vmatprep.subr.bf16.mxu0 %v3108_v58  ;;  %625 = vmatpush1.bf16.msra.mxu1 %v3101_v2  ;;  %v4149_v58 = vsub.s32 1, %v4138_v55  ;;  %v666_v59 = vrot.slane %v4146_v57, %v4141_v56 }
  0x99   :  { %626 = vmatprep.subr.bf16.mxu1 %v3110_v3 }
  0x9a   :  { %v670_v60 = vrot.slane %v4146_v57, %v4149_v58  ;;  %v703_v62 = vpack.c.bf16 %v666_v59, %v666_v59  ;;  %v3660_v59 = vld [vmem:[#allocation4 + $0x214] ss:$12 sps:$4 sm:$0xff]  }
  0x9b   :  { %586 = vmatpush1.bf16.msra.mxu0 %v3107_v1  ;;  %v678_v1 = vrot.slane %v4146_v57, %v677_v61 }
  0x9c   :  { %1423 = vmatprep.subr.bf16.mxu0 %v3566_v63  ;;  %627 = vmatpush1.bf16.msra.mxu1 %v3109_v7  ;;  %v704_v63 = vpack.c.bf16 %v670_v60, %v670_v60  ;;  %v712_v2 = vpack.i.b16 %v703_v62, %v703_v62  ;;  %v3661_v60 = vld [vmem:[#allocation4 + $0x2d8] ss:$12 sps:$4 sm:$0xff]  }
  0x9d   :  { %3352 = vmatprep.subr.bf16.mxu1 %v3591_v6 }
  0x9e   :  { %604 = vmatmul.mubr.bf16.vlgmr.msra.gmra.mrb[4].mxu0 %v4130_v8  ;;  %v719_v3 = vpack.i.b16 %v704_v63, %v704_v63 }
  0x9f   :  { %1424 = vmatpush1.bf16.msra.mxu0 %v3564_v4  ;;  %645 = vmatmul.mubr.bf16.vlgmr.msra.gmra.mrb[4].mxu1 %v4130_v8  ;;  %v3579_v8 = vld [vmem:[#allocation4 + $0x78] ss:$12 sps:$4 sm:$0xff]   ;;  %v706_v4 = vpack.c.bf16 %v678_v1, %v678_v1  ;;  %v3658_v1 = vld [vmem:[#allocation4 + $0x210] ss:$12 sps:$4 sm:$0xff]  }
  0xa0   :  { %1425 = vmatprep.subr.bf16.mxu0 %v3569_v5  ;;  %3353 = vmatpush3.bf16.msra.mxu1 %v3592_v11  ;;  %v717_v5 = vrot.slane %v712_v2, %v4141_v56  ;;  %v724_v7 = vrot.slane %v719_v3, %v4141_v56  ;;  %v3662_v2 = vld [vmem:[#allocation4 + $0x218] ss:$12 sps:$4 sm:$0xff]  }
  0xa1   :  { %3354 = vmatprep.subr.bf16.mxu1 %v3596_v12  ;;  %v733_v11 = vpack.i.b16 %v706_v4, %v706_v4  ;;  %v3665_v3 = vld [vmem:[#allocation4 + $0x22c] ss:$12 sps:$4 sm:$0xff]   ;;  %v3666_v4 = vld [vmem:[#allocation4 + $0x2f0] ss:$12 sps:$4 sm:$0xff]  }
  0xa3   :  { %1426 = vmatpush1.bf16.msra.mxu0 %v3567_v9 }
  0xa4   :  { %1427 = vmatprep.subr.bf16.mxu0 %v3572_v10  ;;  %3355 = vmatpush3.bf16.msra.mxu1 %v3597_v15 }
  0xa5   :  { %3356 = vmatprep.subr.bf16.mxu1 %v3601_v16 }
  0xa7   :  { %1428 = vmatpush1.bf16.msra.mxu0 %v3570_v13 }
  0xa8   :  { %1429 = vmatprep.subr.bf16.mxu0 %v3575_v14  ;;  %3357 = vmatpush3.bf16.msra.mxu1 %v3602_v19 }
  0xa9   :  { %3358 = vmatprep.subr.bf16.mxu1 %v3606_v20  ;;  %v3628_v20 = vld [vmem:[#allocation4 + $0x180] ss:$12 sps:$4 sm:$0xff]  }
  0xab   :  { %1430 = vmatpush1.bf16.msra.mxu0 %v3573_v17 }
  0xac   :  { %1431 = vmatprep.subr.bf16.mxu0 %v3578_v18  ;;  %3359 = vmatpush3.bf16.msra.mxu1 %v3607_v23  ;;  %v738_v18 = vrot.slane %v733_v11, %v4141_v56  ;;  %v3667_v11 = vld [vmem:[#allocation4 + $0x230] ss:$12 sps:$4 sm:$0xff]  }
  0xad   :  { %3360 = vmatprep.subr.bf16.mxu1 %v3611_v24  ;;  %v3635_v24 = vld [vmem:[#allocation4 + $0x19c] ss:$12 sps:$4 sm:$0xff]  }
  0xaf   :  { %1432 = vmatpush1.bf16.msra.mxu0 %v3576_v21  ;;  %v3632_v21 = vld [vmem:[#allocation4 + $0x188] ss:$12 sps:$4 sm:$0xff]  }
  0xb0   :  { %1433 = vmatprep.subr.bf16.mxu0 %v3581_v22  ;;  %3361 = vmatpush3.bf16.msra.mxu1 %v3612_v26 }
  0xb1   :  { %3362 = vmatprep.subr.bf16.mxu1 %v3616_v27 }
  0xb3   :  { %1434 = vmatpush1.bf16.msra.mxu0 %v3579_v8  ;;  %v3636_v8 = vld [vmem:[#allocation4 + $0x260] ss:$12 sps:$4 sm:$0xff]  }
  0xb4   :  { %1435 = vmatprep.subr.bf16.mxu0 %v3584_v25  ;;  %3363 = vmatpush3.bf16.msra.mxu1 %v3617_v30  ;;  %v3637_v30 = vld [vmem:[#allocation4 + $0x1a0] ss:$12 sps:$4 sm:$0xff]  }
  0xb5   :  { %3364 = vmatprep.subr.bf16.mxu1 %v3621_v44  ;;  %v3651_v44 = vld [vmem:[#allocation4 + $0x2a8] ss:$12 sps:$4 sm:$0xff]  }
  0xb7   :  { %1436 = vmatpush1.bf16.msra.mxu0 %v3582_v28 }
  0xb8   :  { %1437 = vmatprep.subr.bf16.mxu0 %v3587_v29  ;;  %3365 = vmatpush3.bf16.msra.mxu1 %v3622_v46  ;;  %v3633_v29 = vld [vmem:[#allocation4 + $0x198] ss:$12 sps:$4 sm:$0xff]  }
  0xb9   :  { %3366 = vmatprep.subr.bf16.mxu1 %v3626_v48  ;;  %v3652_v48 = vld [vmem:[#allocation4 + $0x1e8] ss:$12 sps:$4 sm:$0xff]  }
  0xbb   :  { %1438 = vmatpush1.bf16.msra.mxu0 %v3585_v31  ;;  %v3640_v31 = vld [vmem:[#allocation4 + $0x1b4] ss:$12 sps:$4 sm:$0xff]  }
  0xbc   :  { %1439 = vmatprep.subr.bf16.mxu0 %v3590_v32  ;;  %3367 = vmatpush3.bf16.msra.mxu1 %v3627_v50  ;;  %v3641_v32 = vld [vmem:[#allocation4 + $0x278] ss:$12 sps:$4 sm:$0xff]   ;;  %v3656_v50 = vld [vmem:[#allocation4 + $0x2c0] ss:$12 sps:$4 sm:$0xff]  }
  0xbd   :  { %3374 = vmatprep.subr.bf16.mxu1 %v3631_v52 }
  0xbf   :  { %1440 = vmatpush1.bf16.msra.mxu0 %v3588_v33 }
  0xc0   :  { %1441 = vmatprep.subr.bf16.mxu0 %v3595_v34  ;;  %v4166_v34 = vsub.s32 2, %v4138_v55 }
  0xc3   :  { %1442 = vmatpush1.bf16.msra.mxu0 %v3593_v35  ;;  %v3638_v35 = vld [vmem:[#allocation4 + $0x1b0] ss:$12 sps:$4 sm:$0xff]  }
  0xc4   :  { %1443 = vmatprep.subr.bf16.mxu0 %v3600_v36  ;;  %v3642_v36 = vld [vmem:[#allocation4 + $0x1b8] ss:$12 sps:$4 sm:$0xff]  }
  0xc7   :  { %1444 = vmatpush1.bf16.msra.mxu0 %v3598_v37  ;;  %v3645_v37 = vld [vmem:[#allocation4 + $0x1cc] ss:$12 sps:$4 sm:$0xff]  }
  0xc8   :  { %1445 = vmatprep.subr.bf16.mxu0 %v3605_v38  ;;  %v3646_v38 = vld [vmem:[#allocation4 + $0x290] ss:$12 sps:$4 sm:$0xff]  }
  0xcb   :  { %1446 = vmatpush1.bf16.msra.mxu0 %v3603_v39  ;;  %v685_v39 = vsub.s32 5, %v4138_v55 }
  0xcc   :  { %1447 = vmatprep.subr.bf16.mxu0 %v3610_v40  ;;  %v674_v40 = vrot.slane %v4146_v57, %v4166_v34 }
  0xce   :  { %v705_v46 = vpack.c.bf16 %v674_v40, %v674_v40  ;;  %v3692_v40 = vld [vmem:[#allocation4 + $0x2a0] ss:$12 sps:$4 sm:$0xff]  }
  0xcf   :  { %1448 = vmatpush1.bf16.msra.mxu0 %v3608_v41  ;;  %v3643_v41 = vld [vmem:[#allocation4 + $0x1c8] ss:$12 sps:$4 sm:$0xff]  }
  0xd0   :  { %1449 = vmatprep.subr.bf16.mxu0 %v3615_v42  ;;  %v3647_v42 = vld [vmem:[#allocation4 + $0x1d0] ss:$12 sps:$4 sm:$0xff]   ;;  %v726_v52 = vpack.i.b16 %v705_v46, %v705_v46  ;;  %v3706_v46 = vld [vmem:[#allocation4 + $0x2d4] ss:$12 sps:$4 sm:$0xff]  }
  0xd2   :  { %v731_v63 = vrot.slane %v726_v52, %v4141_v56  ;;  %v3710_v52 = vld [vmem:[#allocation4 + $0x2e8] ss:$12 sps:$4 sm:$0xff]  }
  0xd3   :  { %1450 = vmatpush1.bf16.msra.mxu0 %v3613_v43  ;;  %v3650_v43 = vld [vmem:[#allocation4 + $0x1e4] ss:$12 sps:$4 sm:$0xff]  }
  0xd4   :  { %1451 = vmatprep.subr.bf16.mxu0 %v3620_v45  ;;  %v686_v45 = vrot.slane %v4146_v57, %v685_v39  ;;  %v3697_v39 = vld [vmem:[#allocation6 + $0x64] ss:$12 sps:$4 sm:$0xff]  }
  0xd7   :  { %1452 = vmatpush1.bf16.msra.mxu0 %v3618_v47  ;;  %v3648_v47 = vld [vmem:[#allocation4 + $0x1e0] ss:$12 sps:$4 sm:$0xff]  }
  0xd8   :  { %1453 = vmatprep.subr.bf16.mxu0 %v3625_v49  ;;  %v3655_v49 = vld [vmem:[#allocation4 + $0x1fc] ss:$12 sps:$4 sm:$0xff]  }
  0xdb   :  { %1454 = vmatpush1.bf16.msra.mxu0 %v3623_v51  ;;  %v708_v51 = vpack.c.bf16 %v686_v45, %v686_v45  ;;  %v3701_v45 = vld [vmem:[#allocation6 + $0x78] ss:$12 sps:$4 sm:$0xff]  }
  0xdc   :  { %1464 = vmatprep.subr.bf16.mxu0 %v3630_v53  ;;  %v3653_v53 = vld [vmem:[#allocation4 + $0x1f8] ss:$12 sps:$4 sm:$0xff]  }
  0xdd   :  { %v747_v61 = vpack.i.b16 %v708_v51, %v708_v51  ;;  %v3715_v51 = vld [vmem:[#allocation6 + $0xac] ss:$12 sps:$4 sm:$0xff]  }
 0x151   :  { %v523_v6 = vpop.f32.mrb[0].mxu0  ;;  %v4159_v17 = vpop.f32.mrb[0].mxu1 }
 0x152   :  { %v654_v9 = vpack.c.bf16 %v523_v6, %v523_v6  ;;  %v525_v10 = vpop.f32.mrb[1].mxu0  ;;  %v566_v22 = vpop.f32.mrb[1].mxu1  ;;  %v656_v62 = vpack.c.bf16 %v4159_v17, %v4159_v17  ;;  %v752_v6 = vrot.slane %v747_v61, %v4141_v56  ;;  %v3720_v61 = vld [vmem:[#allocation6 + $0x8] ss:$12 sps:$4 sm:$0xff]  }
 0x153   :  { %v655_v12 = vpack.c.bf16 %v525_v10, %v525_v10  ;;  %v527_v13 = vpop.f32.mrb[2].mxu0  ;;  %v657_v25 = vpack.c.bf16 %v566_v22, %v566_v22  ;;  %v568_v26 = vpop.f32.mrb[2].mxu1  ;;  %v3663_v10 = vld [vmem:[#allocation4 + $0x228] ss:$12 sps:$4 sm:$0xff]  }
 0x154   :  { %v767_v14 = vadd.bf16 %v717_v5, %v654_v9  ;;  %v528_v15 = vpop.f32.mrb[3].mxu0  ;;  %v569_v27 = vpop.f32.mrb[3].mxu1 }
 0x155   :  { %v768_v16 = vadd.bf16 %v724_v7, %v655_v12  ;;  %v770_v28 = vadd.bf16 %v738_v18, %v657_v25  ;;  %v769_v7 = vadd.bf16 %v731_v63, %v656_v62  ;;  %v3673_v15 = vld [vmem:[#allocation6 + $0x4] ss:$12 sps:$4 sm:$0xff]   ;;  %v3723_v62 = vld [vmem:[#allocation6 + $0xdc] ss:$12 sps:$4 sm:$0xff]   ;;  %v3724_v63 = vld [vmem:[#allocation6 + $0xe0] ss:$12 sps:$4 sm:$0xff]  }
 0x156   :  { %v775_v23 = vmax.bf16 %v3995_v0, %v767_v14  ;;  %v3670_v14 = vld [vmem:[#allocation4 + $0x244] ss:$12 sps:$4 sm:$0xff]  }
 0x157   :  { %v776_v19 = vmax.bf16 %v3995_v0, %v768_v16  ;;  %v778_v33 = vmax.bf16 %v3995_v0, %v770_v28  ;;  %v4179_v18 = vmax.bf16 %v3995_v0, %v769_v7  ;;  %v3674_v27 = vld [vmem:[#allocation4 + $0x258] ss:$12 sps:$4 sm:$0xff]   ;;  %v3726_v7 = vld [vmem:[#allocation6 + $0xf0] ss:$12 sps:$4 sm:$0xff]  }
 0x158   :  { %v3677_v28 = vld [vmem:[#allocation6 + $0x18] ss:$12 sps:$4 sm:$0xff]  }
 0x159   :  { %1455 = vmatprep.mubr.bf16.mxu0 %v776_v19  ;;  %1537 = vmatprep.mubr.bf16.mxu1 %v776_v19 }
 0x15a   :  { %1456 = vmatmul.mubr.bf16.vlgmr.msra.gmra.mrb[8].mxu0 %v775_v23  ;;  %1538 = vmatmul.mubr.bf16.vlgmr.msra.gmra.mrb[8].mxu1 %v775_v23  ;;  %v3676_v23 = vld [vmem:[#allocation4 + $0x25c] ss:$12 sps:$4 sm:$0xff]  }
 0x15b   :  { %1465 = vmatpush1.bf16.msra.mxu0 %v3628_v20  ;;  %3375 = vmatpush3.bf16.msra.mxu1 %v3632_v21  ;;  %v3668_v20 = vld [vmem:[#allocation4 + $0x240] ss:$12 sps:$4 sm:$0xff]  }
 0x15c   :  { %1466 = vmatprep.subr.bf16.mxu0 %v3635_v24  ;;  %3376 = vmatprep.subr.bf16.mxu1 %v3636_v8  ;;  %v3671_v21 = vld [vmem:[#allocation6] ss:$12 sps:$4 sm:$0xff]   ;;  %v3679_v24 = vld [vmem:[#allocation6 + $0x1c] ss:$12 sps:$4 sm:$0xff]  }
 0x15d   :  { %1496 = vmatprep.mubr.bf16.mxu0 %v778_v33  ;;  %1577 = vmatprep.mubr.bf16.mxu1 %v778_v33  ;;  %v3688_v33 = vld [vmem:[#allocation4 + $0x28c] ss:$12 sps:$4 sm:$0xff]  }
 0x15f   :  { %1467 = vmatpush1.bf16.msra.mxu0 %v3633_v29  ;;  %3377 = vmatpush3.bf16.msra.mxu1 %v3637_v30  ;;  %v3682_v29 = vld [vmem:[#allocation4 + $0x274] ss:$12 sps:$4 sm:$0xff]  }
 0x160   :  { %1468 = vmatprep.subr.bf16.mxu0 %v3640_v31  ;;  %3378 = vmatprep.subr.bf16.mxu1 %v3641_v32  ;;  %v3685_v30 = vld [vmem:[#allocation6 + $0x34] ss:$12 sps:$4 sm:$0xff]   ;;  %v3680_v31 = vld [vmem:[#allocation4 + $0x270] ss:$12 sps:$4 sm:$0xff]  }
 0x161   :  { %v3683_v32 = vld [vmem:[#allocation6 + $0x30] ss:$12 sps:$4 sm:$0xff]  }
 0x163   :  { %1469 = vmatpush1.bf16.msra.mxu0 %v3638_v35  ;;  %3379 = vmatpush3.bf16.msra.mxu1 %v3642_v36  ;;  %v3691_v35 = vld [vmem:[#allocation6 + $0x4c] ss:$12 sps:$4 sm:$0xff]   ;;  %v3686_v36 = vld [vmem:[#allocation4 + $0x288] ss:$12 sps:$4 sm:$0xff]  }
 0x164   :  { %1470 = vmatprep.subr.bf16.mxu0 %v3645_v37  ;;  %3380 = vmatprep.subr.bf16.mxu1 %v3646_v38  ;;  %v3689_v37 = vld [vmem:[#allocation6 + $0x48] ss:$12 sps:$4 sm:$0xff]   ;;  %v3694_v38 = vld [vmem:[#allocation4 + $0x2a4] ss:$12 sps:$4 sm:$0xff]  }
 0x167   :  { %1471 = vmatpush1.bf16.msra.mxu0 %v3643_v41  ;;  %3381 = vmatpush3.bf16.msra.mxu1 %v3647_v42  ;;  %v3695_v41 = vld [vmem:[#allocation6 + $0x60] ss:$12 sps:$4 sm:$0xff]   ;;  %v3700_v42 = vld [vmem:[#allocation4 + $0x2bc] ss:$12 sps:$4 sm:$0xff]  }
 0x168   :  { %1472 = vmatprep.subr.bf16.mxu0 %v3650_v43  ;;  %3382 = vmatprep.subr.bf16.mxu1 %v3651_v44  ;;  %v3703_v43 = vld [vmem:[#allocation6 + $0x7c] ss:$12 sps:$4 sm:$0xff]   ;;  %v3698_v44 = vld [vmem:[#allocation4 + $0x2b8] ss:$12 sps:$4 sm:$0xff]  }
 0x16b   :  { %1473 = vmatpush1.bf16.msra.mxu0 %v3648_v47  ;;  %3383 = vmatpush3.bf16.msra.mxu1 %v3652_v48  ;;  %v3709_v47 = vld [vmem:[#allocation6 + $0x94] ss:$12 sps:$4 sm:$0xff]   ;;  %v3704_v48 = vld [vmem:[#allocation4 + $0x2d0] ss:$12 sps:$4 sm:$0xff]  }
 0x16c   :  { %1474 = vmatprep.subr.bf16.mxu0 %v3655_v49  ;;  %3384 = vmatprep.subr.bf16.mxu1 %v3656_v50  ;;  %v3707_v49 = vld [vmem:[#allocation6 + $0x90] ss:$12 sps:$4 sm:$0xff]   ;;  %v3712_v50 = vld [vmem:[#allocation4 + $0x2ec] ss:$12 sps:$4 sm:$0xff]  }
 0x16f   :  { %1475 = vmatpush1.bf16.msra.mxu0 %v3653_v53  ;;  %3385 = vmatpush3.bf16.msra.mxu1 %v3657_v54  ;;  %v3713_v53 = vld [vmem:[#allocation6 + $0xa8] ss:$12 sps:$4 sm:$0xff]   ;;  %v3718_v54 = vld [vmem:[#allocation6 + $0xc4] ss:$12 sps:$4 sm:$0xff]  }
 0x170   :  { %1476 = vmatprep.subr.bf16.mxu0 %v3660_v59  ;;  %3386 = vmatprep.subr.bf16.mxu1 %v3661_v60  ;;  %v3719_v59 = vld [vmem:[#allocation6 + $0xc8] ss:$12 sps:$4 sm:$0xff]   ;;  %v3716_v60 = vld [vmem:[#allocation6 + $0xc0] ss:$12 sps:$4 sm:$0xff]  }
 0x171   :  { %v4175_v5 = vpop.f32.mrb[4].mxu0 }
 0x172   :  { %v607_v9 = vpop.f32.mrb[5].mxu0  ;;  %v4181_v19 = vpop.f32.mrb[4].mxu1 }
 0x173   :  { %1477 = vmatpush1.bf16.msra.mxu0 %v3658_v1  ;;  %3387 = vmatpush3.bf16.msra.mxu1 %v3662_v2  ;;  %v659_v12 = vpack.c.bf16 %v607_v9, %v607_v9  ;;  %v609_v13 = vpop.f32.mrb[6].mxu0  ;;  %v4183_v22 = vpop.f32.mrb[5].mxu1  ;;  %v3721_v1 = vld [vmem:[#allocation6 + $0xd8] ss:$12 sps:$4 sm:$0xff]   ;;  %v3725_v2 = vld [vmem:[#allocation6 + $0x20] ss:$12 sps:$4 sm:$0xff]  }
 0x174   :  { %1478 = vmatprep.subr.bf16.mxu0 %v3665_v3  ;;  %3388 = vmatprep.subr.bf16.mxu1 %v3666_v4  ;;  %v610_v16 = vpop.f32.mrb[7].mxu0  ;;  %v650_v8 = vpop.f32.mrb[6].mxu1  ;;  %v3728_v3 = vld [vmem:[#allocation6 + $0xf4] ss:$12 sps:$4 sm:$0xff]   ;;  %v3729_v4 = vld [vmem:[#allocation6 + $0xf8] ss:$12 sps:$4 sm:$0xff]  }
 0x175   :  { %v772_v17 = vadd.bf16 %v752_v6, %v659_v12  ;;  %v651_v26 = vpop.f32.mrb[7].mxu1  ;;  %v681_v6 = vsub.s32 4, %v4138_v55  ;;  %v3730_v9 = vld [vmem:[#allocation6 + $0x38] ss:$12 sps:$4 sm:$0xff]   ;;  %v693_v12 = vsub.s32 7, %v4138_v55 }
 0x176   :  { %v3738_v16 = vld [vmem:[#allocation6 + $0x124] ss:$12 sps:$4 sm:$0xff]   ;;  %v3744_v8 = vld [vmem:[#allocation6 + $0x140] ss:$12 sps:$4 sm:$0xff]  }
 0x177   :  { %1479 = vmatpush1.bf16.msra.mxu0 %v3663_v10  ;;  %3389 = vmatpush3.bf16.msra.mxu1 %v3667_v11  ;;  %v4186_v25 = vmax.bf16 %v3995_v0, %v772_v17  ;;  %v3733_v10 = vld [vmem:[#allocation6 + $0x10c] ss:$12 sps:$4 sm:$0xff]   ;;  %v3734_v11 = vld [vmem:[#allocation6 + $0x110] ss:$12 sps:$4 sm:$0xff]   ;;  %v682_v13 = vrot.slane %v4146_v57, %v681_v6  ;;  %v3739_v17 = vld [vmem:[#allocation6 + $0x128] ss:$12 sps:$4 sm:$0xff]  }
 0x178   :  { %1480 = vmatprep.subr.bf16.mxu0 %v3670_v14  ;;  %2275 = vmatprep.subr.bf16.mxu1 %v3673_v15  ;;  %v3731_v14 = vld [vmem:[#allocation6 + $0x108] ss:$12 sps:$4 sm:$0xff]   ;;  %v3735_v15 = vld [vmem:[#allocation6 + $0x50] ss:$12 sps:$4 sm:$0xff]  }
 0x179   :  { %v3779_v6 = vld [vmem:[#allocation6 + $0x2a8] ss:$12 sps:$4 sm:$0xff]  }
 0x17a   :  { %1578 = vmatmul.mubr.bf16.vlgmr.msra.gmra.mrb[12].mxu1 %v4179_v18 }
 0x17b   :  { %1481 = vmatpush1.bf16.msra.mxu0 %v3668_v20  ;;  %2276 = vmatpush1.bf16.msra.mxu1 %v3671_v21  ;;  %v707_v20 = vpack.c.bf16 %v682_v13, %v682_v13  ;;  %v3736_v21 = vld [vmem:[#allocation6 + $0x120] ss:$12 sps:$4 sm:$0xff]  }
 0x17c   :  { %1482 = vmatprep.subr.bf16.mxu0 %v3676_v23  ;;  %2277 = vmatprep.subr.bf16.mxu1 %v3679_v24  ;;  %v3740_v23 = vld [vmem:[#allocation6 + $0x68] ss:$12 sps:$4 sm:$0xff]   ;;  %v3785_v13 = vld [vmem:[#allocation6 + $0x200] ss:$12 sps:$4 sm:$0xff]  }
 0x17d   :  { %2307 = vmatprep.mubr.bf16.mxu1 %v4186_v25  ;;  %v3743_v24 = vld [vmem:[#allocation6 + $0x13c] ss:$12 sps:$4 sm:$0xff]   ;;  %v740_v26 = vpack.i.b16 %v707_v20, %v707_v20  ;;  %v3790_v20 = vld [vmem:[#allocation6 + $0x218] ss:$12 sps:$4 sm:$0xff]  }
 0x17f   :  { %1483 = vmatpush1.bf16.msra.mxu0 %v3674_v27  ;;  %2278 = vmatpush1.bf16.msra.mxu1 %v3677_v28  ;;  %v3741_v27 = vld [vmem:[#allocation6 + $0x138] ss:$12 sps:$4 sm:$0xff]   ;;  %v3745_v28 = vld [vmem:[#allocation6 + $0x80] ss:$12 sps:$4 sm:$0xff]  }
 0x180   :  { %1484 = vmatprep.subr.bf16.mxu0 %v3682_v29  ;;  %2279 = vmatprep.subr.bf16.mxu1 %v3685_v30  ;;  %v3748_v29 = vld [vmem:[#allocation6 + $0x154] ss:$12 sps:$4 sm:$0xff]   ;;  %v3749_v30 = vld [vmem:[#allocation6 + $0x158] ss:$12 sps:$4 sm:$0xff]  }
 0x183   :  { %1485 = vmatpush1.bf16.msra.mxu0 %v3680_v31  ;;  %2280 = vmatpush1.bf16.msra.mxu1 %v3683_v32  ;;  %v658_v32 = vpack.c.bf16 %v4175_v5, %v4175_v5  ;;  %v3755_v5 = vld [vmem:[#allocation6 + $0xb0] ss:$12 sps:$4 sm:$0xff]  }
 0x184   :  { %1486 = vmatprep.subr.bf16.mxu0 %v3688_v33  ;;  %2281 = vmatprep.subr.bf16.mxu1 %v3691_v35  ;;  %v745_v33 = vrot.slane %v740_v26, %v4141_v56  ;;  %v3746_v35 = vld [vmem:[#allocation6 + $0x150] ss:$12 sps:$4 sm:$0xff]  }
 0x185   :  { %v3798_v26 = vld [vmem:[#allocation6 + $0x244] ss:$12 sps:$4 sm:$0xff]  }
 0x187   :  { %1487 = vmatpush1.bf16.msra.mxu0 %v3686_v36  ;;  %2282 = vmatpush1.bf16.msra.mxu1 %v3689_v37  ;;  %v3750_v36 = vld [vmem:[#allocation6 + $0x98] ss:$12 sps:$4 sm:$0xff]  }
 0x188   :  { %1488 = vmatprep.subr.bf16.mxu0 %v3694_v38  ;;  %2283 = vmatprep.subr.bf16.mxu1 %v3697_v39  ;;  %v3753_v37 = vld [vmem:[#allocation6 + $0x16c] ss:$12 sps:$4 sm:$0xff]   ;;  %v3754_v38 = vld [vmem:[#allocation6 + $0x170] ss:$12 sps:$4 sm:$0xff]   ;;  %v661_v39 = vpack.c.bf16 %v4183_v22, %v4183_v22 }
 0x189   :  { %v3763_v22 = vld [vmem:[#allocation6 + $0x19c] ss:$12 sps:$4 sm:$0xff]  }
 0x18b   :  { %1489 = vmatpush1.bf16.msra.mxu0 %v3692_v40  ;;  %2284 = vmatpush1.bf16.msra.mxu1 %v3695_v41  ;;  %v771_v41 = vadd.bf16 %v745_v33, %v658_v32  ;;  %v3807_v32 = vld [vmem:[#allocation6 + $0x28c] ss:$12 sps:$4 sm:$0xff]   ;;  %v3805_v33 = vld [vmem:[#allocation6 + $0x288] ss:$12 sps:$4 sm:$0xff]  }
 0x18c   :  { %1490 = vmatprep.subr.bf16.mxu0 %v3700_v42  ;;  %2285 = vmatprep.subr.bf16.mxu1 %v3703_v43  ;;  %v3751_v42 = vld [vmem:[#allocation6 + $0x168] ss:$12 sps:$4 sm:$0xff]   ;;  %v3758_v43 = vld [vmem:[#allocation6 + $0x184] ss:$12 sps:$4 sm:$0xff]  }
 0x18f   :  { %1491 = vmatpush1.bf16.msra.mxu0 %v3698_v44  ;;  %2286 = vmatpush1.bf16.msra.mxu1 %v3701_v45  ;;  %v3759_v44 = vld [vmem:[#allocation6 + $0x248] ss:$12 sps:$4 sm:$0xff]  }
 0x190   :  { %1492 = vmatprep.subr.bf16.mxu0 %v3706_v46  ;;  %2287 = vmatprep.subr.bf16.mxu1 %v3709_v47  ;;  %v779_v46 = vmax.bf16 %v3995_v0, %v771_v41  ;;  %v3756_v47 = vld [vmem:[#allocation6 + $0x180] ss:$12 sps:$4 sm:$0xff]  }
 0x191   :  { %v3819_v41 = vld [vmem:[#allocation6 + $0x2ec] ss:$12 sps:$4 sm:$0xff]  }
 0x193   :  { %1493 = vmatpush1.bf16.msra.mxu0 %v3704_v48  ;;  %2288 = vmatpush1.bf16.msra.mxu1 %v3707_v49  ;;  %v3760_v48 = vld [vmem:[#allocation6 + $0x188] ss:$12 sps:$4 sm:$0xff]   ;;  %v3764_v49 = vld [vmem:[#allocation6 + $0x260] ss:$12 sps:$4 sm:$0xff]  }
 0x194   :  { %1494 = vmatprep.subr.bf16.mxu0 %v3712_v50  ;;  %2289 = vmatprep.subr.bf16.mxu1 %v3715_v51  ;;  %v3761_v51 = vld [vmem:[#allocation6 + $0x198] ss:$12 sps:$4 sm:$0xff]  }
 0x197   :  { %1495 = vmatpush1.bf16.msra.mxu0 %v3710_v52  ;;  %2290 = vmatpush1.bf16.msra.mxu1 %v3713_v53  ;;  %v3765_v52 = vld [vmem:[#allocation6 + $0x1a0] ss:$12 sps:$4 sm:$0xff]  }
 0x198   :  { %2291 = vmatprep.subr.bf16.mxu1 %v3718_v54  ;;  %3396 = vmatprep.subr.bf16.mxu0 %v3719_v59  ;;  %v3768_v53 = vld [vmem:[#allocation6 + $0x1b4] ss:$12 sps:$4 sm:$0xff]   ;;  %v3769_v54 = vld [vmem:[#allocation6 + $0x278] ss:$12 sps:$4 sm:$0xff]   ;;  %v689_v59 = vsub.s32 6, %v4138_v55 }
 0x199   :  { %v3776_v55 = vld [vmem:[#allocation6 + $0x1e0] ss:$12 sps:$4 sm:$0xff]  }
 0x19a   :  { %1497 = vmatmul.mubr.bf16.vlgmr.msra.gmra.mrb[8].mxu0 %v4179_v18  ;;  %v694_v18 = vrot.slane %v4146_v57, %v693_v12 }
 0x19b   :  { %2292 = vmatpush1.bf16.msra.mxu1 %v3716_v60  ;;  %3397 = vmatpush3.bf16.msra.mxu0 %v3720_v61  ;;  %v3766_v60 = vld [vmem:[#allocation6 + $0x1b0] ss:$12 sps:$4 sm:$0xff]   ;;  %v3770_v61 = vld [vmem:[#allocation6 + $0x1b8] ss:$12 sps:$4 sm:$0xff]  }
 0x19c   :  { %2293 = vmatprep.subr.bf16.mxu1 %v3723_v62  ;;  %3398 = vmatprep.subr.bf16.mxu0 %v3724_v63  ;;  %v3773_v62 = vld [vmem:[#allocation6 + $0x1cc] ss:$12 sps:$4 sm:$0xff]   ;;  %v3774_v63 = vld [vmem:[#allocation6 + $0x290] ss:$12 sps:$4 sm:$0xff]  }
 0x19d   :  { %2389 = vmatprep.mubr.bf16.mxu0 %v4186_v25  ;;  %v710_v25 = vpack.c.bf16 %v694_v18, %v694_v18  ;;  %v3786_v18 = vld [vmem:[#allocation6 + $0x210] ss:$12 sps:$4 sm:$0xff]  }
 0x19f   :  { %2294 = vmatpush1.bf16.msra.mxu1 %v3721_v1  ;;  %3399 = vmatpush3.bf16.msra.mxu0 %v3725_v2  ;;  %v761_v31 = vpack.i.b16 %v710_v25, %v710_v25  ;;  %v690_v1 = vrot.slane %v4146_v57, %v689_v59  ;;  %v3771_v2 = vld [vmem:[#allocation6 + $0x1c8] ss:$12 sps:$4 sm:$0xff]   ;;  %v3781_v57 = vld [vmem:[#allocation6 + $0x1f8] ss:$12 sps:$4 sm:$0xff]   ;;  %v3795_v25 = vld [vmem:[#allocation6 + $0x230] ss:$12 sps:$4 sm:$0xff]  }
 0x1a0   :  { %2295 = vmatprep.subr.bf16.mxu1 %v3728_v3  ;;  %3400 = vmatprep.subr.bf16.mxu0 %v3729_v4  ;;  %v3775_v3 = vld [vmem:[#allocation6 + $0x1d0] ss:$12 sps:$4 sm:$0xff]  }
 0x1a1   :  { %v766_v40 = vrot.slane %v761_v31, %v4141_v56  ;;  %v3778_v4 = vld [vmem:[#allocation6 + $0x1e4] ss:$12 sps:$4 sm:$0xff]   ;;  %v3828_v59 = vld [vmem:[#allocation9 + $0xb8] sm:$0xff]  }
 0x1a2   :  { %v3802_v31 = vld [vmem:[#allocation6 + $0x270] ss:$12 sps:$4 sm:$0xff]  }
 0x1a3   :  { %2296 = vmatpush1.bf16.msra.mxu1 %v3726_v7  ;;  %3401 = vmatpush3.bf16.msra.mxu0 %v3730_v9  ;;  %v774_v45 = vadd.bf16 %v766_v40, %v661_v39  ;;  %v709_v7 = vpack.c.bf16 %v690_v1, %v690_v1  ;;  %v3780_v9 = vld [vmem:[#allocation6 + $0x1e8] ss:$12 sps:$4 sm:$0xff]   ;;  %v3814_v40 = vld [vmem:[#allocation6 + $0x2d0] ss:$12 sps:$4 sm:$0xff]  }
 0x1a4   :  { %2297 = vmatprep.subr.bf16.mxu1 %v3733_v10  ;;  %3402 = vmatprep.subr.bf16.mxu0 %v3734_v11  ;;  %v3783_v10 = vld [vmem:[#allocation6 + $0x1fc] ss:$12 sps:$4 sm:$0xff]   ;;  %v3784_v11 = vld [vmem:[#allocation6 + $0x2c0] ss:$12 sps:$4 sm:$0xff]   ;;  %v3835_v1 = vld [vmem:[#allocation9 + $0x10] sm:$0xff]  }
 0x1a5   :  { %v782_v50 = vmax.bf16 %v3995_v0, %v774_v45  ;;  %v754_v12 = vpack.i.b16 %v709_v7, %v709_v7  ;;  %v3816_v39 = vld [vmem:[#allocation6 + $0x2d4] ss:$12 sps:$4 sm:$0xff]   ;;  %v3842_v7 = vld [vmem:[#allocation9 + $0x68] sm:$0xff]  }
 0x1a6   :  { %v3822_v45 = vld [vmem:[#allocation9 + $0x90] sm:$0xff]  }
 0x1a7   :  { %2298 = vmatpush1.bf16.msra.mxu1 %v3731_v14  ;;  %3403 = vmatpush3.bf16.msra.mxu0 %v3735_v15  ;;  %v3788_v14 = vld [vmem:[#allocation6 + $0x214] ss:$12 sps:$4 sm:$0xff]   ;;  %v3789_v15 = vld [vmem:[#allocation6 + $0x2d8] ss:$12 sps:$4 sm:$0xff]  }
 0x1a8   :  { %2299 = vmatprep.subr.bf16.mxu1 %v3738_v16  ;;  %3404 = vmatprep.subr.bf16.mxu0 %v3739_v17  ;;  %v660_v16 = vpack.c.bf16 %v4181_v19, %v4181_v19  ;;  %v759_v17 = vrot.slane %v754_v12, %v4141_v56 }
 0x1ab   :  { %2300 = vmatpush1.bf16.msra.mxu1 %v3736_v21  ;;  %3405 = vmatpush3.bf16.msra.mxu0 %v3740_v23  ;;  %v3793_v21 = vld [vmem:[#allocation6 + $0x22c] ss:$12 sps:$4 sm:$0xff]   ;;  %v3794_v23 = vld [vmem:[#allocation6 + $0x2f0] ss:$12 sps:$4 sm:$0xff]  }
 0x1ac   :  { %2301 = vmatprep.subr.bf16.mxu1 %v3743_v24  ;;  %3406 = vmatprep.subr.bf16.mxu0 %v3744_v8  ;;  %v773_v24 = vadd.bf16 %v759_v17, %v660_v16  ;;  %v3791_v8 = vld [vmem:[#allocation6 + $0x228] ss:$12 sps:$4 sm:$0xff]   ;;  %v3850_v17 = vld [vmem:[#allocation9 + $0x38] sm:$0xff]  }
 0x1ae   :  { %v781_v19 = vmax.bf16 %v3995_v0, %v773_v24 }
 0x1af   :  { %2302 = vmatpush1.bf16.msra.mxu1 %v3741_v27  ;;  %3407 = vmatpush3.bf16.msra.mxu0 %v3745_v28  ;;  %v3796_v27 = vld [vmem:[#allocation6 + $0x240] ss:$12 sps:$4 sm:$0xff]   ;;  %v3801_v28 = vld [vmem:[#allocation6 + $0x25c] ss:$12 sps:$4 sm:$0xff]  }
 0x1b0   :  { %2303 = vmatprep.subr.bf16.mxu1 %v3748_v29  ;;  %3408 = vmatprep.subr.bf16.mxu0 %v3749_v30  ;;  %v3799_v29 = vld [vmem:[#allocation6 + $0x258] ss:$12 sps:$4 sm:$0xff]   ;;  %v3804_v30 = vld [vmem:[#allocation6 + $0x274] ss:$12 sps:$4 sm:$0xff]  }
 0x1b3   :  { %2304 = vmatpush1.bf16.msra.mxu1 %v3746_v35  ;;  %3409 = vmatpush3.bf16.msra.mxu0 %v3750_v36  ;;  %v3810_v35 = vld [vmem:[#allocation6 + $0x2a4] ss:$12 sps:$4 sm:$0xff]   ;;  %v3808_v36 = vld [vmem:[#allocation6 + $0x2a0] ss:$12 sps:$4 sm:$0xff]  }
 0x1b4   :  { %2305 = vmatprep.subr.bf16.mxu1 %v3753_v37  ;;  %3410 = vmatprep.subr.bf16.mxu0 %v3754_v38  ;;  %v3813_v37 = vld [vmem:[#allocation6 + $0x2bc] ss:$12 sps:$4 sm:$0xff]   ;;  %v3811_v38 = vld [vmem:[#allocation6 + $0x2b8] ss:$12 sps:$4 sm:$0xff]  }
 0x1b7   :  { %2306 = vmatpush1.bf16.msra.mxu1 %v3751_v42  ;;  %3411 = vmatpush3.bf16.msra.mxu0 %v3755_v5  ;;  %v3817_v42 = vld [vmem:[#allocation6 + $0x2e8] ss:$12 sps:$4 sm:$0xff]   ;;  %v3820_v5 = vld [vmem:[#allocation9 + $0x80] sm:$0xff]  }
 0x1b8   :  { %2316 = vmatprep.subr.bf16.mxu1 %v3758_v43  ;;  %3418 = vmatprep.subr.bf16.mxu0 %v3759_v44  ;;  %v3996_v43 = vmov 0.0   ;;  %v3821_v44 = vld [vmem:[#allocation9 + $0x88] sm:$0xff]  }
 0x1ba   :  { %2308 = vmatmul.mubr.bf16.vlgmr.msra.gmra.mrb[16].mxu1 %v779_v46  ;;  %2390 = vmatmul.mubr.bf16.vlgmr.msra.gmra.mrb[12].mxu0 %v779_v46  ;;  %v3823_v46 = vld [vmem:[#allocation9 + $0x98] sm:$0xff]  }
 0x1bb   :  { %2317 = vmatpush1.bf16.msra.mxu1 %v3756_v47  ;;  %3419 = vmatpush3.bf16.msra.mxu0 %v3760_v48  ;;  %v3824_v47 = vld [vmem:[#allocation9 + $0xa0] sm:$0xff]   ;;  %v3825_v48 = vld [vmem:[#allocation9 + $0xa8] sm:$0xff]  }
 0x1bc   :  { %2318 = vmatprep.subr.bf16.mxu1 %v3763_v22  ;;  %3420 = vmatprep.subr.bf16.mxu0 %v3764_v49 }
 0x1bd   :  { %2429 = vmatprep.mubr.bf16.mxu0 %v782_v50  ;;  %2348 = vmatprep.mubr.bf16.mxu1 %v782_v50 }
 0x1bf   :  { %2319 = vmatpush1.bf16.msra.mxu1 %v3761_v51  ;;  %3421 = vmatpush3.bf16.msra.mxu0 %v3765_v52  ;;  %v3826_v52 = vld [vmem:[#allocation9 + $0xb0] sm:$0xff]  }
 0x1c0   :  { %2320 = vmatprep.subr.bf16.mxu1 %v3768_v53  ;;  %3422 = vmatprep.subr.bf16.mxu0 %v3769_v54  ;;  %v3827_v54 = vld [vmem:[#allocation9 + $0x40] sm:$0xff]  }
 0x1c3   :  { %2321 = vmatpush1.bf16.msra.mxu1 %v3766_v60  ;;  %3423 = vmatpush3.bf16.msra.mxu0 %v3770_v61  ;;  %v3829_v60 = vld [vmem:[#allocation9] sm:$0xff]   ;;  %v3830_v61 = vld [vmem:[#allocation9 + $0x48] sm:$0xff]  }
 0x1c4   :  { %2322 = vmatprep.subr.bf16.mxu1 %v3773_v62  ;;  %3424 = vmatprep.subr.bf16.mxu0 %v3774_v63  ;;  %v3832_v62 = vld [vmem:[#allocation9 + $0x8] sm:$0xff]   ;;  %v3833_v63 = vld [vmem:[#allocation9 + $0x50] sm:$0xff]  }
 0x1c7   :  { %2323 = vmatpush1.bf16.msra.mxu1 %v3771_v2  ;;  %3425 = vmatpush3.bf16.msra.mxu0 %v3775_v3  ;;  %v3836_v2 = vld [vmem:[#allocation9 + $0x58] sm:$0xff]  }
 0x1c8   :  { %2324 = vmatprep.subr.bf16.mxu1 %v3778_v4  ;;  %3426 = vmatprep.subr.bf16.mxu0 %v3779_v6  ;;  %v3838_v3 = vld [vmem:[#allocation9 + $0x18] sm:$0xff]   ;;  %v3839_v4 = vld [vmem:[#allocation9 + $0x60] sm:$0xff]  }
 0x1c9   :  { %v3841_v6 = vld [vmem:[#allocation9 + $0x20] sm:$0xff]  }
 0x1cb   :  { %2325 = vmatpush1.bf16.msra.mxu1 %v3776_v55  ;;  %3427 = vmatpush3.bf16.msra.mxu0 %v3780_v9  ;;  %v3844_v55 = vld [vmem:[#allocation9 + $0x28] sm:$0xff]   ;;  %v3845_v9 = vld [vmem:[#allocation9 + $0x70] sm:$0xff]  }
 0x1cc   :  { %2326 = vmatprep.subr.bf16.mxu1 %v3783_v10  ;;  %3428 = vmatprep.subr.bf16.mxu0 %v3784_v11  ;;  %v3847_v11 = vld [vmem:[#allocation9 + $0x30] sm:$0xff]  }
 0x1cf   :  { %2327 = vmatpush1.bf16.msra.mxu1 %v3781_v57  ;;  %3429 = vmatpush3.bf16.msra.mxu0 %v3785_v13 }
 0x1d0   :  { %2328 = vmatprep.subr.bf16.mxu1 %v3788_v14  ;;  %3430 = vmatprep.subr.bf16.mxu0 %v3789_v15  ;;  %v3848_v15 = vld [vmem:[#allocation9 + $0x78] sm:$0xff]  }
 0x1d3   :  { %2329 = vmatpush1.bf16.msra.mxu1 %v3786_v18  ;;  %3431 = vmatpush3.bf16.msra.mxu0 %v3790_v20  ;;  %v3851_v18 = vld [vmem:[#allocation7 + $0x40] sm:$0xff]  }
 0x1d4   :  { %2330 = vmatprep.subr.bf16.mxu1 %v3793_v21  ;;  %3432 = vmatprep.subr.bf16.mxu0 %v3794_v23 }
 0x1d7   :  { %2331 = vmatpush1.bf16.msra.mxu1 %v3791_v8  ;;  %3433 = vmatpush3.bf16.msra.mxu0 %v3795_v25 }
 0x1d8   :  { %2332 = vmatprep.subr.bf16.mxu1 %v3798_v26  ;;  %3440 = vmatprep.subr.bf16.mxu0 %v3827_v54  ;;  %v3843_v54 = vld [vmem:[#allocation7 + $0xa0] sm:$0xff]  }
 0x1da   :  { %2430 = vmatmul.mubr.bf16.vlgmr.msra.gmra.mrb[16].mxu0 %v781_v19 }
 0x1db   :  { %2333 = vmatpush1.bf16.msra.mxu1 %v3796_v27  ;;  %3441 = vmatpush3.bf16.msra.mxu0 %v3829_v60 }
 0x1dc   :  { %2334 = vmatprep.subr.bf16.mxu1 %v3801_v28  ;;  %3442 = vmatprep.subr.bf16.mxu0 %v3830_v61  ;;  %v2437_v28 = vld [vmem:[%s4283_s6] sm:$0x7] }
 0x1df   :  { %2335 = vmatpush1.bf16.msra.mxu1 %v3799_v29  ;;  %3443 = vmatpush3.bf16.msra.mxu0 %v3832_v62  ;;  %v2453_v29 = vrot.slane %v2437_v28, %v4166_v34 }
 0x1e0   :  { %2336 = vmatprep.subr.bf16.mxu1 %v3804_v30  ;;  %3444 = vmatprep.subr.bf16.mxu0 %v3833_v63 }
 0x1e1   :  { %v2459_v30 = vpack.c.bf16 %v2453_v29, %v2453_v29 }
 0x1e3   :  { %2337 = vmatpush1.bf16.msra.mxu1 %v3802_v31  ;;  %3445 = vmatpush3.bf16.msra.mxu0 %v3835_v1 }
 0x1e4   :  { %2338 = vmatprep.subr.bf16.mxu1 %v3807_v32  ;;  %3446 = vmatprep.subr.bf16.mxu0 %v3836_v2  ;;  %v2475_v32 = vpack.i.b16 %v2459_v30, %v2459_v30  ;;  %v3860_v30 = vld [vmem:[#allocation7 + $0x60] sm:$0xff]  }
 0x1e7   :  { %2339 = vmatpush1.bf16.msra.mxu1 %v3805_v33  ;;  %3447 = vmatpush3.bf16.msra.mxu0 %v3838_v3 }
 0x1e8   :  { %2340 = vmatprep.subr.bf16.mxu1 %v3810_v35  ;;  %3448 = vmatprep.subr.bf16.mxu0 %v3839_v4 }
 0x1eb   :  { %2341 = vmatpush1.bf16.msra.mxu1 %v3808_v36  ;;  %3449 = vmatpush3.bf16.msra.mxu0 %v3841_v6 }
 0x1ec   :  { %2342 = vmatprep.subr.bf16.mxu1 %v3813_v37  ;;  %3450 = vmatprep.subr.bf16.mxu0 %v3842_v7 }
 0x1ef   :  { %2343 = vmatpush1.bf16.msra.mxu1 %v3811_v38  ;;  %3451 = vmatpush3.bf16.msra.mxu0 %v3844_v55  ;;  %v3849_v55 = vld [vmem:[#allocation7 + $0xb0] sm:$0xff]  }
 0x1f0   :  { %2344 = vmatprep.subr.bf16.mxu1 %v3816_v39  ;;  %3452 = vmatprep.subr.bf16.mxu0 %v3845_v9  ;;  %v2480_v39 = vrot.slane %v2475_v32, %v4141_v56 }
 0x1f3   :  { %2345 = vmatpush1.bf16.msra.mxu1 %v3814_v40  ;;  %3453 = vmatpush3.bf16.msra.mxu0 %v3847_v11 }
 0x1f4   :  { %2346 = vmatprep.subr.bf16.mxu1 %v3819_v41  ;;  %3454 = vmatprep.subr.bf16.mxu0 %v3848_v15 }
 0x1f7   :  { %2347 = vmatpush1.bf16.msra.mxu1 %v3817_v42  ;;  %3455 = vmatpush3.bf16.msra.mxu0 %v3850_v17  ;;  %v3831_v42 = vld [vmem:[#allocation7 + $0x80] sm:$0xff]   ;;  %v3852_v17 = vld [vmem:[#allocation7 + $0xb8] sm:$0xff]  }
 0x1f8   :  { %3502 = vmatprep.subr.bf16.mxu1 %v3996_v43  ;;  %3471 = vmatprep.subr.bf16.mxu0 %v3851_v18 }
 0x1fa   :  { %2349 = vmatmul.mubr.bf16.vlgmr.msra.gmra.mrb[16].mxu1 %v781_v19 }
 0x1fb   :  { %3503 = vmatpush3.bf16.msra.mxu1 %v3820_v5  ;;  %3518 = vmatprep.mubr.msk.bf16.mxu1 %vm3997_vm0, %v3996_v43 }
 0x1fc   :  { %3504 = vmatprep.subr.bf16.mxu1 %v3996_v43 }
 0x1ff   :  { %3505 = vmatpush3.bf16.msra.mxu1 %v3821_v44  ;;  %v3834_v44 = vld [vmem:[#allocation7 + $0x88] sm:$0xff]  }
 0x200   :  { %3506 = vmatprep.subr.bf16.mxu1 %v3996_v43 }
 0x203   :  { %3507 = vmatpush3.bf16.msra.mxu1 %v3822_v45  ;;  %v3837_v45 = vld [vmem:[#allocation7 + $0x90] sm:$0xff]  }
 0x204   :  { %3508 = vmatprep.subr.bf16.mxu1 %v3996_v43 }
 0x207   :  { %3509 = vmatpush3.bf16.msra.mxu1 %v3823_v46  ;;  %v4240_v46 = vld [vmem:[%s4281_s4] sm:$0x7] }
 0x208   :  { %3510 = vmatprep.subr.bf16.mxu1 %v3996_v43  ;;  %v1593_v29 = vrot.slane %v4240_v46, %v4141_v56 }
 0x20a   :  { %v1605_v32 = vpack.c.bf16 %v1593_v29, %v1593_v29 }
 0x20b   :  { %3511 = vmatpush3.bf16.msra.mxu1 %v3824_v47  ;;  %v2445_v47 = vrot.slane %v2437_v28, %v4141_v56 }
 0x20c   :  { %3512 = vmatprep.subr.bf16.mxu1 %v3996_v43 }
 0x20f   :  { %3513 = vmatpush3.bf16.msra.mxu1 %v3825_v48  ;;  %v1597_v48 = vrot.slane %v4240_v46, %v4149_v58 }
 0x210   :  { %3514 = vmatprep.subr.bf16.mxu1 %v3996_v43 }
 0x213   :  { %3515 = vmatpush3.bf16.msra.mxu1 %v3826_v52  ;;  %v1606_v52 = vpack.c.bf16 %v1597_v48, %v1597_v48 }
 0x214   :  { %3516 = vmatprep.subr.bf16.mxu1 %v3996_v43 }
 0x215   :  { %v1616_v61 = vpack.i.b16 %v1606_v52, %v1606_v52 }
 0x217   :  { %3517 = vmatpush3.bf16.msra.mxu1 %v3828_v59  ;;  %v1621_v2 = vrot.slane %v1616_v61, %v4141_v56 }
 0x218   :  { %3522 = vmatprep.subr.bf16.mxu1 %v3996_v43 }
 0x22d   :  { %v3368_v22 = vpop.f32.mrb[8].mxu1 }
 0x22e   :  { %v3369_v49 = vpop.f32.mrb[9].mxu1 }
 0x22f   :  { %v3370_v50 = vadd.f32 %v3369_v49, %v3368_v22  ;;  %v3371_v51 = vpop.f32.mrb[10].mxu1  ;;  %v2449_v22 = vrot.slane %v2437_v28, %v4149_v58  ;;  %v3840_v49 = vld [vmem:[#allocation7 + $0x98] sm:$0xff]   ;;  %v3846_v58 = vld [vmem:[#allocation7 + $0xa8] sm:$0xff]  }
 0x230   :  { %v3372_v53 = vpop.f32.mrb[11].mxu1  ;;  %v2457_v51 = vpack.c.bf16 %v2445_v47, %v2445_v47  ;;  %v3859_v28 = vld [vmem:[#allocation7 + $0x18] sm:$0xff]  }
 0x231   :  { %v2458_v53 = vpack.c.bf16 %v2449_v22, %v2449_v22 }
 0x232   :  { %v2461_v60 = vpack.i.b16 %v2457_v51, %v2457_v51 }
 0x233   :  { %v2468_v62 = vpack.i.b16 %v2458_v53, %v2458_v53 }
 0x235   :  { %v2473_v4 = vrot.slane %v2468_v62, %v4141_v56 }
 0x24d   :  { %v3390_v10 = vpop.f32.mrb[12].mxu1 }
 0x24e   :  { %v3391_v12 = vpop.f32.mrb[13].mxu1 }
 0x24f   :  { %v3392_v57 = vadd.f32 %v3391_v12, %v3390_v10  ;;  %v3393_v13 = vpop.f32.mrb[14].mxu1 }
 0x250   :  { %v3394_v14 = vpop.f32.mrb[15].mxu1 }
 0x251   :  { %v4221_v16 = vadd.f32 %v3392_v57, %v3370_v50  ;;  %v1601_v50 = vrot.slane %v4240_v46, %v4166_v34  ;;  %v2466_v34 = vrot.slane %v2461_v60, %v4141_v56 }
 0x253   :  { %v1607_v59 = vpack.c.bf16 %v1601_v50, %v1601_v50  ;;  %v1588_v9 = vpack.c.bf16 %v4221_v16, %v4221_v16 }
 0x255   :  { %v1623_v63 = vpack.i.b16 %v1607_v59, %v1607_v59 }
 0x257   :  { %v1628_v10 = vrot.slane %v1623_v63, %v4141_v56 }
 0x259   :  { %v1631_v18 = vadd.bf16 %v1628_v10, %v1588_v9 }
 0x26d   :  { %v4223_v20 = vpop.f32.mrb[8].mxu0 }
 0x26e   :  { %v4225_v21 = vpop.f32.mrb[9].mxu0 }
 0x26f   :  { %v1502_v23 = vpop.f32.mrb[10].mxu0  ;;  %v1587_v1 = vpack.c.bf16 %v4225_v21, %v4225_v21 }
 0x270   :  { %v1503_v24 = vpop.f32.mrb[11].mxu0  ;;  %v3853_v23 = vld [vmem:[#allocation7] sm:$0xff]  }
 0x271   :  { %v1630_v14 = vadd.bf16 %v1621_v2, %v1587_v1  ;;  %v3854_v24 = vld [vmem:[#allocation7 + $0x48] sm:$0xff]  }
 0x28d   :  { %v3412_v8 = vpop.f32.mrb[12].mxu0 }
 0x28e   :  { %v3413_v25 = vpop.f32.mrb[13].mxu0 }
 0x28f   :  { %v3414_v26 = vadd.f32 %v3413_v25, %v3412_v8  ;;  %v3415_v19 = vpop.f32.mrb[14].mxu0  ;;  %v1633_v8 = vmax.bf16 %v3995_v0, %v1630_v14  ;;  %v1634_v25 = vmax.bf16 %v3995_v0, %v1631_v18 }
 0x290   :  { %v3416_v27 = vpop.f32.mrb[15].mxu0  ;;  %v3856_v19 = vld [vmem:[#allocation7 + $0x50] sm:$0xff]  }
 0x291   :  { %v3858_v27 = vld [vmem:[#allocation7 + $0x58] sm:$0xff]  }
 0x2ad   :  { %v3434_v31 = vpop.f32.mrb[16].mxu0 }
 0x2ae   :  { %v3435_v33 = vpop.f32.mrb[17].mxu0 }
 0x2af   :  { %v3436_v35 = vadd.f32 %v3435_v33, %v3434_v31  ;;  %v3437_v36 = vpop.f32.mrb[18].mxu0  ;;  %v3861_v31 = vld [vmem:[#allocation7 + $0x20] sm:$0xff]   ;;  %v3862_v33 = vld [vmem:[#allocation7 + $0x68] sm:$0xff]  }
 0x2b0   :  { %v3438_v37 = vpop.f32.mrb[19].mxu0  ;;  %v1609_v36 = vpack.i.b16 %v1605_v32, %v1605_v32 }
 0x2b1   :  { %v2432_v38 = vadd.f32 %v3436_v35, %v3414_v26  ;;  %v3855_v26 = vld [vmem:[#allocation7 + $0x8] sm:$0xff]   ;;  %v3864_v37 = vld [vmem:[#allocation7 + $0x70] sm:$0xff]  }
 0x2b2   :  { %v3863_v35 = vld [vmem:[#allocation7 + $0x28] sm:$0xff]  }
 0x2b3   :  { %v2440_v40 = vpack.c.bf16 %v2432_v38, %v2432_v38  ;;  %v3865_v38 = vld [vmem:[#allocation7 + $0x30] sm:$0xff]  }
 0x2b5   :  { %v2483_v41 = vadd.bf16 %v2480_v39, %v2440_v40  ;;  %v1586_v39 = vpack.c.bf16 %v4223_v20, %v4223_v20  ;;  %v1614_v40 = vrot.slane %v1609_v36, %v4141_v56 }
 0x2b7   :  { %v2486_v5 = vmax.bf16 %v3995_v0, %v2483_v41  ;;  %v3866_v41 = vld [vmem:[#allocation7 + $0x78] sm:$0xff]  }
 0x2b9   :  { %3519 = vmatmul.mubr.bf16.vlgmr.msra.gmra.mrb[20].mxu1 %v2486_v5  ;;  %v1629_v5 = vadd.bf16 %v1614_v40, %v1586_v39 }
 0x2ba   :  { %3523 = vmatpush3.bf16.msra.mxu1 %v3831_v42  ;;  %3538 = vmatprep.mubr.msk.bf16.mxu1 %vm3997_vm0, %v3996_v43  ;;  %v3867_v42 = vld [vmem:[#allocation7 + $0x38] sm:$0xff]  }
 0x2bb   :  { %3524 = vmatprep.subr.bf16.mxu1 %v3996_v43 }
 0x2be   :  { %3525 = vmatpush3.bf16.msra.mxu1 %v3834_v44  ;;  %v1632_v44 = vmax.bf16 %v3995_v0, %v1629_v5 }
 0x2bf   :  { %3526 = vmatprep.subr.bf16.mxu1 %v3996_v43 }
 0x2c2   :  { %3527 = vmatpush3.bf16.msra.mxu1 %v3837_v45 }
 0x2c3   :  { %3528 = vmatprep.subr.bf16.mxu1 %v3996_v43 }
 0x2c6   :  { %3529 = vmatpush3.bf16.msra.mxu1 %v3840_v49 }
 0x2c7   :  { %3530 = vmatprep.subr.bf16.mxu1 %v3996_v43 }
 0x2ca   :  { %3531 = vmatpush3.bf16.msra.mxu1 %v3843_v54 }
 0x2cb   :  { %3532 = vmatprep.subr.bf16.mxu1 %v3996_v43 }
 0x2cd   :  { %v2350_v3 = vpop.f32.mrb[16].mxu1 }
 0x2ce   :  { %v2438_v6 = vpack.c.bf16 %v2350_v3, %v2350_v3  ;;  %3533 = vmatpush3.bf16.msra.mxu1 %v3846_v58  ;;  %v2352_v7 = vpop.f32.mrb[17].mxu1 }
 0x2cf   :  { %v2439_v11 = vpack.c.bf16 %v2352_v7, %v2352_v7  ;;  %v2354_v12 = vpop.f32.mrb[18].mxu1  ;;  %3534 = vmatprep.subr.bf16.mxu1 %v3996_v43 }
 0x2d0   :  { %v2481_v57 = vadd.bf16 %v2466_v34, %v2438_v6  ;;  %v2355_v13 = vpop.f32.mrb[19].mxu1  ;;  %v3351_v34 = vld [vmem:[%s4286_s9] ss:$0 sm:$0xff] }
 0x2d1   :  { %v2482_v15 = vadd.bf16 %v2473_v4, %v2439_v11 }
 0x2d2   :  { %3535 = vmatpush3.bf16.msra.mxu1 %v3849_v55  ;;  %v2484_v16 = vmax.bf16 %v3995_v0, %v2481_v57 }
 0x2d3   :  { %3536 = vmatprep.subr.bf16.mxu1 %v3996_v43  ;;  %v2485_v21 = vmax.bf16 %v3995_v0, %v2482_v15  ;;  %v3857_v43 = vld [vmem:[#allocation7 + $0x10] sm:$0xff]  }
 0x2d5   :  { %2759 = vmatprep.mubr.bf16.mxu0 %v2485_v21 }
 0x2d6   :  { %3537 = vmatpush3.bf16.msra.mxu1 %v3852_v17  ;;  %2760 = vmatmul.mubr.bf16.vlgmr.msra.gmra.mrb[20].mxu0 %v2484_v16 }
 0x2d7   :  { %3472 = vmatpush3.bf16.msra.mxu0 %v3853_v23  ;;  %2983 = vmatprep.mubr.bf16.mxu0 %v1633_v8 }
 0x2d8   :  { %3473 = vmatprep.subr.bf16.mxu0 %v3854_v24 }
 0x2d9   :  { %3539 = vmatmul.mubr.bf16.vlgmr.msra.gmra.mrb[24].mxu1 %v1634_v25 }
 0x2db   :  { %3474 = vmatpush3.bf16.msra.mxu0 %v3855_v26 }
 0x2dc   :  { %3475 = vmatprep.subr.bf16.mxu0 %v3856_v19 }
 0x2df   :  { %3476 = vmatpush3.bf16.msra.mxu0 %v3857_v43 }
 0x2e0   :  { %3477 = vmatprep.subr.bf16.mxu0 %v3858_v27 }
 0x2e3   :  { %3478 = vmatpush3.bf16.msra.mxu0 %v3859_v28 }
 0x2e4   :  { %3479 = vmatprep.subr.bf16.mxu0 %v3860_v30 }
 0x2e7   :  { %3480 = vmatpush3.bf16.msra.mxu0 %v3861_v31 }
 0x2e8   :  { %3481 = vmatprep.subr.bf16.mxu0 %v3862_v33 }
 0x2eb   :  { %3482 = vmatpush3.bf16.msra.mxu0 %v3863_v35 }
 0x2ec   :  { %3483 = vmatprep.subr.bf16.mxu0 %v3864_v37 }
 0x2ef   :  { %3484 = vmatpush3.bf16.msra.mxu0 %v3865_v38 }
 0x2f0   :  { %3485 = vmatprep.subr.bf16.mxu0 %v3866_v41 }
 0x2f3   :  { %3486 = vmatpush3.bf16.msra.mxu0 %v3867_v42 }
 0x2f6   :  { %2984 = vmatmul.mubr.bf16.vlgmr.msra.gmra.mrb[24].mxu0 %v1632_v44 }
 0x38c   :  { %v2801_v45 = vpop.f32.mrb[20].mxu1 }
 0x38d   :  { %v3520_v46 = vpop.f32.mrb[21].mxu1 }
 0x38e   :  { %v2804_v47 = vpop.f32.mrb[22].mxu1 }
 0x38f   :  { %v3521_v48 = vpop.f32.mrb[23].mxu1 }
 0x3a9   :  { %v3456_v22 = vpop.f32.mrb[20].mxu0 }
 0x3aa   :  { %v3457_v49 = vpop.f32.mrb[21].mxu0 }
 0x3ab   :  { %v3458_v50 = vadd.f32 %v3457_v49, %v3456_v22  ;;  %v3459_v20 = vpop.f32.mrb[22].mxu0 }
 0x3ac   :  { %v3025_v51 = vpop.f32.mrb[24].mxu1  ;;  %v3460_v56 = vpop.f32.mrb[23].mxu0 }
 0x3ad   :  { %v2802_v52 = vadd.f32 %v3458_v50, %v2801_v45  ;;  %v3540_v53 = vpop.f32.mrb[25].mxu1 }
 0x3ae   :  { %v3028_v54 = vpop.f32.mrb[26].mxu1 }
 0x3af   :  { %v3541_v59 = vpop.f32.mrb[27].mxu1 }
 0x3c9   :  { %v3487_v60 = vpop.f32.mrb[24].mxu0 }
 0x3ca   :  { %v3488_v61 = vpop.f32.mrb[25].mxu0 }
 0x3cb   :  { %v3489_v62 = vadd.f32 %v3488_v61, %v3487_v60  ;;  %v3490_v58 = vpop.f32.mrb[26].mxu0 }
 0x3cc   :  { %v3491_v0 = vpop.f32.mrb[27].mxu0 }
 0x3cd   :  { %v2986_v63 = vadd.f32 %v3489_v62, %v2802_v52 }
 0x3cf   :  { %v3026_v1 = vadd.f32 %v3025_v51, %v2986_v63 }
 0x3d1   :  { %v3038_v2 = vadd.f32 %v3351_v34, %v3026_v1 }
 0x3d3   :  { %3039 = vst [vmem:[%s4287_s10] sm:$0xff] %v3038_v2 }
 0x3d4   :  { %3044 = vsyncpa [#allocation3], 1 }
 0x3d5   :  { %3045 = vsyncpa [#allocation5], 1 }
 0x3d6   :  { %3046 = vsyncpa [#allocation8], 1 }

</bundles_post_ra>
